<compile_context>
chip_gen: v6e
topology: v6e:2x2x1
jax: 0.10.0
libtpu: 0.0.40
codegen_flags: <defaults>
</compile_context>

<pallas_src>
import functools

import numpy as np
import jax
import jax.numpy as jnp
from jax.experimental import pallas as pl
from jax.experimental.pallas import tpu as pltpu

CP = 128  # lane width used for activations / conv outputs / weight N dim


# ----------------------------------------------------------------------------
# Model definition (stands in for parse_model_config(config_path))
# ----------------------------------------------------------------------------
MODULE_DEFS = [
    {'type': 'net', 'channels': '3', 'height': '16'},
    {'type': 'convolutional', 'batch_normalize': '1', 'filters': '8',  'size': '3', 'stride': '1', 'activation': 'leaky'},
    {'type': 'convolutional', 'batch_normalize': '1', 'filters': '16', 'size': '3', 'stride': '2', 'activation': 'leaky'},
    {'type': 'convolutional', 'batch_normalize': '1', 'filters': '8',  'size': '1', 'stride': '1', 'activation': 'leaky'},
    {'type': 'convolutional', 'batch_normalize': '1', 'filters': '16', 'size': '3', 'stride': '1', 'activation': 'leaky'},
    {'type': 'shortcut', 'from': '-3', 'activation': 'linear'},
    {'type': 'convolutional', 'batch_normalize': '1', 'filters': '32', 'size': '3', 'stride': '2', 'activation': 'leaky'},
    {'type': 'convolutional', 'batch_normalize': '0', 'filters': '21', 'size': '1', 'stride': '1', 'activation': 'linear'},
    {'type': 'yolo', 'mask': '0,1,2', 'anchors': '2,3, 4,5, 6,8', 'classes': '2'},
    {'type': 'route', 'layers': '-3'},
    {'type': 'convolutional', 'batch_normalize': '1', 'filters': '16', 'size': '1', 'stride': '1', 'activation': 'leaky'},
    {'type': 'upsample', 'stride': '2'},
    {'type': 'route', 'layers': '-1,-7'},
    {'type': 'maxpool', 'size': '2', 'stride': '1'},
    {'type': 'convolutional', 'batch_normalize': '0', 'filters': '21', 'size': '1', 'stride': '1', 'activation': 'linear'},
    {'type': 'yolo', 'mask': '0,1,2', 'anchors': '2,3, 4,5, 6,8', 'classes': '2'},
]


def _round_up(a, b):
    return -(-a // b) * b


def _tpu_vmem_budget():
    """Generation-aware VMEM budget (v5e/v6e: 128 MiB, v7x: 64 MiB)."""
    try:
        cap = int(pltpu.get_tpu_info().vmem_capacity_bytes)
    except Exception:
        cap = 64 * 1024 * 1024          # conservative (v7x-sized) fallback
    limit = min((cap * 3) // 4, 100 * 1024 * 1024)
    budget = (limit * 3) // 4
    return int(budget), int(limit)


_VMEM_BUDGET, _VMEM_LIMIT = _tpu_vmem_budget()


# ----------------------------------------------------------------------------
# Pallas kernel 1: conv as a packed GEMM + bias/shift + LeakyReLU
#   x_ref : (tm, Kp)  bf16  tap-packed input rows (one per output pixel)
#   w_ref : (Kp, 128) bf16  tap-packed weights, BN scale folded in
#   b_ref : (1, 128)  f32   folded BN shift / conv bias
#   r_ref : (tm, 128) bf16  (optional) fused residual (shortcut) to add
#   o_ref : (tm, 128) bf16  output rows
# ----------------------------------------------------------------------------
def _conv_gemm_kernel(x_ref, w_ref, b_ref, o_ref, *, slope):
    acc = jnp.dot(x_ref[...], w_ref[...], preferred_element_type=jnp.float32)
    y = acc + b_ref[...]
    if slope != 1.0:
        y = jnp.maximum(y, slope * y)          # leaky, 2 VALU ops
    o_ref[...] = y.astype(o_ref.dtype)


def _conv_gemm_res_kernel(x_ref, w_ref, b_ref, r_ref, o_ref, *, slope):
    acc = jnp.dot(x_ref[...], w_ref[...], preferred_element_type=jnp.float32)
    y = acc + b_ref[...]
    if slope != 1.0:
        y = jnp.maximum(y, slope * y)
    y = y + r_ref[...].astype(jnp.float32)     # fused shortcut add
    o_ref[...] = y.astype(o_ref.dtype)


def _choose_m_tile(m_tot, kp, budget):
    """Largest divisor of m_tot fitting the VMEM budget, with >=2-4 grid steps
    for larger layers so DMA overlaps compute and the megacore stays busy."""
    per_row = kp * 2 + 3 * CP * 2 + CP * 4          # col + out + residual + f32 acc
    fixed = 2 * (kp * CP * 2 + CP * 4)              # double-buffered weights + shift
    cap = max(8, (budget - fixed) // (2 * per_row))
    if m_tot >= 512:
        cap = min(cap, m_tot // 4)
    elif m_tot >= 128:
        cap = min(cap, m_tot // 2)
    cap = int(min(cap, m_tot))
    tm = m_tot
    t = (cap // 8) * 8
    while t >= 8:
        if m_tot % t == 0:
            tm = t
            break
        t -= 8
    return tm


def _extract_patches(x, cin, k, s, pad):
    """Tap-packed patches: (N,H,W,C) bf16 -> (N*Hout*Wout, Kp) bf16,
    Kp = round_up(k*k*cin, 128), row layout (di, dj, c)."""
    x = x[..., :cin]
    if pad:
        x = jnp.pad(x, ((0, 0), (pad, pad), (pad, pad), (0, 0)))
    n, hp, wp, _ = x.shape
    hout = (hp - k) // s + 1
    wout = (wp - k) // s + 1
    taps = []
    for di in range(k):
        for dj in range(k):
            taps.append(x[:, di:di + s * hout:s, dj:dj + s * wout:s, :])
    col = taps[0] if len(taps) == 1 else jnp.concatenate(taps, axis=-1)
    kp = _round_up(k * k * cin, CP)
    if col.shape[-1] != kp:
        col = jnp.pad(col, ((0, 0), (0, 0), (0, 0), (0, kp - col.shape[-1])))
    return col.reshape(n * hout * wout, kp), hout, wout


def conv_layer(x, cin, p, residual=None):
    """x: (N,H,W,C) bf16 -> (N,Hout,Wout,CP) bf16 (channels 0..cout-1 real)."""
    n, h, w, c = x.shape
    k, s, pad = p['k'], p['stride'], p['pad']
    kp = p['w'].shape[0]

    if k == 1 and s == 1 and c == CP:
        # 1x1 fast path: stored 128-lane activation IS the packed col buffer
        # (pad lanes hit zero weight rows) -> no HBM repack at all.
        hout, wout = h, w
        col = x.reshape(n * h * w, CP)
    else:
        # TODO(synk): for large images fold pad + tap packing into the Pallas
        # input index_map (halo row tiles) instead of one XLA repack.
        col, hout, wout = _extract_patches(x, cin, k, s, pad)

    m_tot = n * hout * wout
    m_pad = _round_up(m_tot, 8)
    if m_pad != m_tot:
        col = jnp.pad(col, ((0, m_pad - m_tot), (0, 0)))

    tm = _choose_m_tile(m_pad, kp, _VMEM_BUDGET)
    grid = (m_pad // tm,)

    in_specs = [
        pl.BlockSpec((tm, kp), lambda i: (i, 0)),
        pl.BlockSpec((kp, CP), lambda i: (0, 0)),
        pl.BlockSpec((1, CP), lambda i: (0, 0)),
    ]
    args = [col, p['w'], p['shift']]
    if residual is not None:
        r = residual.reshape(n * hout * wout, CP)
        if m_pad != m_tot:
            r = jnp.pad(r, ((0, m_pad - m_tot), (0, 0)))
        in_specs.append(pl.BlockSpec((tm, CP), lambda i: (i, 0)))
        args.append(r)
        kernel = functools.partial(_conv_gemm_res_kernel, slope=p['slope'])
    else:
        kernel = functools.partial(_conv_gemm_kernel, slope=p['slope'])

    out = pl.pallas_call(
        kernel,
        out_shape=jax.ShapeDtypeStruct((m_pad, CP), jnp.bfloat16),
        grid=grid,
        in_specs=in_specs,
        out_specs=pl.BlockSpec((tm, CP), lambda i: (i, 0)),
        compiler_params=pltpu.CompilerParams(
            dimension_semantics=("parallel",),
            vmem_limit_bytes=_VMEM_LIMIT),
    )(*args)

    return out[:m_tot].reshape(n, hout, wout, CP)


# ----------------------------------------------------------------------------
# Pallas kernel 2: YOLO decode on the lane-dense NHWC head output
#   x_ref   : (1, g, g, CP) bf16 raw head logits (channel c = a*(5+C)+d, c<21)
#   vec_ref : (4, CP)       f32 rows = [is_x, is_y, is_wh, per-channel mul]
#   o_ref   : (1, g, g, CP) f32 decoded boxes (already scaled by stride/anchors)
# ----------------------------------------------------------------------------
def _yolo_decode_kernel(x_ref, vec_ref, o_ref):
    p = x_ref[...].astype(jnp.float32)                          # (1, g, g, CP)
    vecs = vec_ref[...]                                         # (4, CP)
    is_x, is_y, is_wh, mul = vecs[0:1], vecs[1:2], vecs[2:3], vecs[3:4]

    col = jax.lax.broadcasted_iota(jnp.int32, p.shape, 2).astype(jnp.float32)
    row = jax.lax.broadcasted_iota(jnp.int32, p.shape, 1).astype(jnp.float32)

    sig = 1.0 / (1.0 + jnp.exp(-p))     # exact sigmoid (matches torch.sigmoid)
    ex = jnp.exp(p)                     # exact exp for w/h channels
    base = jnp.where(is_wh > 0.5, ex, sig)
    o_ref[...] = (base + is_x * col + is_y * row) * mul


def yolo_layer_forward(x, anchors, num_classes, img_dim):
    """x: (N, g, g, CP) bf16 head output (21 real channels) -> (N, A*g*g, 5+C)."""
    n, g, _, _ = x.shape
    a_n = len(anchors)
    d = num_classes + 5
    stride = float(img_dim) / float(g)

    # tiny per-channel decode table built host-side (constant under jit)
    c_idx = np.arange(CP)
    dd = c_idx % d
    aa = np.minimum(c_idx // d, a_n - 1)
    valid = c_idx < a_n * d
    is_x = ((dd == 0) & valid).astype(np.float32)
    is_y = ((dd == 1) & valid).astype(np.float32)
    is_wh = (((dd == 2) | (dd == 3)) & valid).astype(np.float32)
    aw = np.array([anc[0] for anc in anchors], np.float32)
    ah = np.array([anc[1] for anc in anchors], np.float32)
    mul = np.ones(CP, np.float32)
    mul = np.where((dd == 0) | (dd == 1), stride, mul)
    mul = np.where(dd == 2, aw[aa], mul)    # exp(w) * (anchor_w/stride) * stride
    mul = np.where(dd == 3, ah[aa], mul)
    mul = np.where(valid, mul, 1.0).astype(np.float32)
    vecs = jnp.asarray(np.stack([is_x, is_y, is_wh, mul], axis=0))  # (4, CP)

    decoded = pl.pallas_call(
        _yolo_decode_kernel,
        out_shape=jax.ShapeDtypeStruct((n, g, g, CP), jnp.float32),
        grid=(n,),
        in_specs=[pl.BlockSpec((1, g, g, CP), lambda i: (i, 0, 0, 0)),
                  pl.BlockSpec((4, CP), lambda i: (0, 0))],
        out_specs=pl.BlockSpec((1, g, g, CP), lambda i: (i, 0, 0, 0)),
        compiler_params=pltpu.CompilerParams(
            dimension_semantics=("parallel",),
            vmem_limit_bytes=_VMEM_LIMIT),
    )(x, vecs)

    # (N, g, g, A, D) -> (N, A, g, g, D) -> (N, A*g*g, D)  (PyTorch ordering)
    out = decoded[..., :a_n * d].reshape(n, g, g, a_n, d)
    out = out.transpose(0, 3, 1, 2, 4).reshape(n, a_n * g * g, d)
    return out


# ----------------------------------------------------------------------------
# Glue layers (channels-last, bf16).
# TODO(synk): fold maxpool(2,1) / nearest-upsample / route concat into the
# consuming conv's patch packing (they are tiny XLA ops at these sizes).
# ----------------------------------------------------------------------------
def pad_channels(x, cp=CP):
    c = x.shape[-1]
    if c == cp:
        return x
    return jnp.pad(x, ((0, 0), (0, 0), (0, 0), (0, cp - c)))


def maxpool_nhwc(x, k, s):
    pad = (k - 1) // 2
    if k == 2 and s == 1:
        x = jnp.pad(x, ((0, 0), (0, 1), (0, 1), (0, 0)))  # ZeroPad2d((0,1,0,1))
    if pad:
        x = jnp.pad(x, ((0, 0), (pad, pad), (pad, pad), (0, 0)),
                    constant_values=-jnp.inf)
    h, w = x.shape[1], x.shape[2]
    hout = (h - k) // s + 1
    wout = (w - k) // s + 1
    out = None
    for i in range(k):
        for j in range(k):
            win = x[:, i:i + s * hout:s, j:j + s * wout:s, :]
            out = win if out is None else jnp.maximum(out, win)
    return out


def upsample_nearest_nhwc(x, scale):
    return jnp.repeat(jnp.repeat(x, scale, axis=1), scale, axis=2)


# ----------------------------------------------------------------------------
# Deterministic parameter construction (mirrors create_modules shapes)
# ----------------------------------------------------------------------------
def build_params(module_defs, key):
    hyper = module_defs[0]
    out_filters = [int(hyper['channels'])]
    params = []
    for mdef in module_defs[1:]:
        p = None
        filters = out_filters[-1]
        t = mdef['type']
        if t == 'convolutional':
            bn = int(mdef['batch_normalize'])
            filters = int(mdef['filters'])
            k = int(mdef['size'])
            cin = out_filters[-1]
            key, k1, k2, k3, k4, k5 = jax.random.split(key, 6)
            w = jax.random.normal(k1, (filters, cin, k, k), jnp.float32)
            w = w * (0.1 / float(cin * k * k) ** 0.5)
            eps = 1e-5
            if bn:
                gamma = 1.0 + 0.1 * jax.random.normal(k2, (filters,), jnp.float32)
                beta = 0.1 * jax.random.normal(k3, (filters,), jnp.float32)
                rmean = 0.1 * jax.random.normal(k4, (filters,), jnp.float32)
                rvar = 0.5 + jax.random.uniform(k5, (filters,), jnp.float32)
                scale = gamma / jnp.sqrt(rvar + eps)
                shift = beta - rmean * scale
            else:
                bias = 0.1 * jax.random.normal(k2, (filters,), jnp.float32)
                scale = jnp.ones((filters,), jnp.float32)
                shift = bias
            # fold BN scale into the weights; pack taps along K (rows ordered
            # (di, dj, cin) to match _extract_patches); pad K to 128-lane slabs
            w_eff = w * scale[:, None, None, None]
            w_k = jnp.transpose(w_eff, (2, 3, 1, 0)).reshape(k * k * cin, filters)
            kp = _round_up(k * k * cin, CP)
            w_pad = jnp.zeros((kp, CP), jnp.float32)
            w_pad = w_pad.at[:k * k * cin, :filters].set(w_k)
            shift_pad = jnp.zeros((1, CP), jnp.float32).at[0, :filters].set(shift)
            slope = 0.1 if mdef['activation'] == 'leaky' else 1.0
            p = dict(w=w_pad.astype(jnp.bfloat16), shift=shift_pad, slope=slope,
                     k=k, stride=int(mdef['stride']), pad=(k - 1) // 2,
                     cout=filters)
        elif t == 'route':
            layers = [int(v) for v in mdef['layers'].split(',')]
            filters = sum(out_filters[1:][i] for i in layers)
        elif t == 'shortcut':
            filters = out_filters[1:][int(mdef['from'])]
        elif t == 'yolo':
            anchor_idxs = [int(v) for v in mdef['mask'].split(',')]
            a = [int(v) for v in mdef['anchors'].split(',')]
            anchors = [(a[i], a[i + 1]) for i in range(0, len(a), 2)]
            anchors = [anchors[i] for i in anchor_idxs]
            p = dict(anchors=anchors, num_classes=int(mdef['classes']))
        params.append(p)
        out_filters.append(filters)
    return params


def _referenced_layers(defs):
    """Absolute layer indices referenced by any route/shortcut layer."""
    refs = set()
    for j, mdef in enumerate(defs):
        if mdef['type'] == 'route':
            for li in mdef['layers'].split(','):
                li = int(li)
                refs.add(li if li >= 0 else j + li)
        elif mdef['type'] == 'shortcut':
            li = int(mdef['from'])
            refs.add(li if li >= 0 else j + li)
    return refs


# ----------------------------------------------------------------------------
# Darknet forward (inference path, targets=None)
# ----------------------------------------------------------------------------
def darknet_forward(x_nchw, module_defs, params):
    img_dim = x_nchw.shape[2]
    defs = module_defs[1:]
    refs = _referenced_layers(defs)

    # NCHW -> NHWC once at entry; bf16 activations end-to-end
    x = jnp.transpose(x_nchw, (0, 2, 3, 1)).astype(jnp.bfloat16)
    c_real = x.shape[-1]

    layer_outputs, yolo_outputs = [], []
    skip_shortcut = False
    for idx, (mdef, p) in enumerate(zip(defs, params)):
        t = mdef['type']
        if t == 'convolutional':
            residual = None
            # fuse an immediately-following shortcut add into this conv's
            # epilogue, provided this conv's own output is not referenced later
            if (idx + 1 < len(defs) and defs[idx + 1]['type'] == 'shortcut'
                    and idx not in refs):
                src = (idx + 1) + int(defs[idx + 1]['from'])
                if 0 <= src < len(layer_outputs):
                    cand = layer_outputs[src][0]
                    n_, h_, w_, _ = x.shape
                    ho = (h_ + 2 * p['pad'] - p['k']) // p['stride'] + 1
                    wo = (w_ + 2 * p['pad'] - p['k']) // p['stride'] + 1
                    if cand.ndim == 4 and cand.shape == (n_, ho, wo, CP):
                        residual = cand
                        skip_shortcut = True
            x = conv_layer(x, c_real, p, residual=residual)
            c_real = p['cout']
        elif t == 'maxpool':
            x = maxpool_nhwc(x, int(mdef['size']), int(mdef['stride']))
        elif t == 'upsample':
            x = upsample_nearest_nhwc(x, int(mdef['stride']))
        elif t == 'route':
            idxs = [int(li) for li in mdef['layers'].split(',')]
            if len(idxs) == 1:
                x, c_real = layer_outputs[idxs[0]]
            else:
                parts = [layer_outputs[i][0][..., :layer_outputs[i][1]]
                         for i in idxs]
                x = pad_channels(jnp.concatenate(parts, axis=-1))
                c_real = sum(layer_outputs[i][1] for i in idxs)
        elif t == 'shortcut':
            li = int(mdef['from'])
            if skip_shortcut:
                # add already happened in the producing conv's epilogue
                skip_shortcut = False
            else:
                x = layer_outputs[-1][0] + layer_outputs[li][0]
            c_real = layer_outputs[li][1]
        elif t == 'yolo':
            x = yolo_layer_forward(x, p['anchors'], p['num_classes'], img_dim)
            c_real = None
            yolo_outputs.append(x)
        layer_outputs.append((x, c_real))
    return jnp.concatenate(yolo_outputs, axis=1)


if __name__ == "__main__":
    key = jax.random.PRNGKey(0)
    kx, kparam = jax.random.split(key)
    x = jax.random.normal(kx, (2, 3, 16, 16), jnp.float32)  # NCHW, like PyTorch
    params = build_params(MODULE_DEFS, kparam)

    fwd = jax.jit(lambda inp: darknet_forward(inp, MODULE_DEFS, params))
    out = fwd(x)
    jax.block_until_ready(out)

    # two YOLO heads: 3 anchors * (4*4 + 8*8) cells = 240 boxes, 5+2 channels
    assert out.shape == (2, 240, 7), out.shape
    assert bool(jnp.all(jnp.isfinite(out)))
    print("KERNEL_OK")
</pallas_src>

<mosaic_0001>
module attributes {stable_mosaic.version = 11 : i64} {
  func.func @_conv_gemm_kernel(%arg0: i32, %arg1: memref<128x128xbf16, #tpu.memory_space<vmem>>, %arg2: memref<128x128xbf16, #tpu.memory_space<vmem>>, %arg3: memref<1x128xf32, #tpu.memory_space<vmem>>, %arg4: memref<128x128xbf16, #tpu.memory_space<vmem>>) attributes {dimension_semantics = [#tpu.dimension_semantics<parallel>], iteration_bounds = array<i64: 4>, scalar_prefetch = 0 : i64, scratch_operands = 0 : i64, tpu.core_type = #tpu.core_type<tc>, window_params = [{transform_indices = @transform_0, window_bounds = array<i64: 128, 128>}, {pipeline_mode = #tpu.pipeline_mode<synchronous>, transform_indices = @transform_1, window_bounds = array<i64: 128, 128>}, {pipeline_mode = #tpu.pipeline_mode<synchronous>, transform_indices = @transform_2, window_bounds = array<i64: 1, 128>}, {transform_indices = @transform_3, window_bounds = array<i64: 128, 128>}]} {
    %c0 = arith.constant 0 : index
    %c0_0 = arith.constant 0 : index
    %0 = vector.load %arg1[%c0, %c0_0] : memref<128x128xbf16, #tpu.memory_space<vmem>>, vector<128x128xbf16>
    %c0_1 = arith.constant 0 : index
    %c0_2 = arith.constant 0 : index
    %1 = vector.load %arg2[%c0_1, %c0_2] : memref<128x128xbf16, #tpu.memory_space<vmem>>, vector<128x128xbf16>
    %cst = arith.constant dense<0.000000e+00> : vector<128x128xf32>
    %2 = tpu.matmul %0, %1, %cst {dimension_numbers = #tpu.dot_dimension_numbers<[1], [0], [0], [1], [0, 0, 1, 1], [], []>} : vector<128x128xbf16>, vector<128x128xbf16>, vector<128x128xf32> -> vector<128x128xf32>
    %c0_3 = arith.constant 0 : index
    %c0_4 = arith.constant 0 : index
    %3 = vector.load %arg3[%c0_3, %c0_4] : memref<1x128xf32, #tpu.memory_space<vmem>>, vector<1x128xf32>
    %4 = vector.broadcast %3 : vector<1x128xf32> to vector<128x128xf32>
    %5 = arith.addf %2, %4 : vector<128x128xf32>
    %cst_5 = arith.constant 1.000000e-01 : f32
    %6 = vector.broadcast %cst_5 : f32 to vector<128x128xf32>
    %7 = arith.mulf %6, %5 : vector<128x128xf32>
    %8 = arith.maximumf %5, %7 : vector<128x128xf32>
    %9 = arith.truncf %8 : vector<128x128xf32> to vector<128x128xbf16>
    %c0_6 = arith.constant 0 : index
    %c0_7 = arith.constant 0 : index
    %10 = vector.load %arg4[%c0_6, %c0_7] : memref<128x128xbf16, #tpu.memory_space<vmem>>, vector<128x128xbf16>
    tpu.vector_store %arg4[%c0_6, %c0_7], %9 {strides = array<i32>} : memref<128x128xbf16, #tpu.memory_space<vmem>>, vector<128x128xbf16>,
    return
  }
  func.func @transform_0(%arg0: i32) -> (i32, i32) {
    %c0_i32 = arith.constant 0 : i32
    %c0_i32_0 = arith.constant 0 : i32
    return %arg0, %c0_i32 : i32, i32
  }
  func.func @transform_1(%arg0: i32) -> (i32, i32) {
    %c0_i32 = arith.constant 0 : i32
    %c0_i32_0 = arith.constant 0 : i32
    %c0_i32_1 = arith.constant 0 : i32
    return %c0_i32, %c0_i32_0 : i32, i32
  }
  func.func @transform_2(%arg0: i32) -> (i32, i32) {
    %c0_i32 = arith.constant 0 : i32
    %c0_i32_0 = arith.constant 0 : i32
    %c0_i32_1 = arith.constant 0 : i32
    return %c0_i32, %c0_i32_0 : i32, i32
  }
  func.func @transform_3(%arg0: i32) -> (i32, i32) {
    %c0_i32 = arith.constant 0 : i32
    %c0_i32_0 = arith.constant 0 : i32
    return %arg0, %c0_i32 : i32, i32
  }
}

module attributes {stable_mosaic.version = 11 : i64} {
  func.func @_conv_gemm_kernel(%arg0: i32, %arg1: memref<64x128xbf16, #tpu.memory_space<vmem>>, %arg2: memref<128x128xbf16, #tpu.memory_space<vmem>>, %arg3: memref<1x128xf32, #tpu.memory_space<vmem>>, %arg4: memref<64x128xbf16, #tpu.memory_space<vmem>>) attributes {dimension_semantics = [#tpu.dimension_semantics<parallel>], iteration_bounds = array<i64: 2>, scalar_prefetch = 0 : i64, scratch_operands = 0 : i64, tpu.core_type = #tpu.core_type<tc>, window_params = [{transform_indices = @transform_0, window_bounds = array<i64: 64, 128>}, {pipeline_mode = #tpu.pipeline_mode<synchronous>, transform_indices = @transform_1, window_bounds = array<i64: 128, 128>}, {pipeline_mode = #tpu.pipeline_mode<synchronous>, transform_indices = @transform_2, window_bounds = array<i64: 1, 128>}, {transform_indices = @transform_3, window_bounds = array<i64: 64, 128>}]} {
    %c0 = arith.constant 0 : index
    %c0_0 = arith.constant 0 : index
    %0 = vector.load %arg1[%c0, %c0_0] : memref<64x128xbf16, #tpu.memory_space<vmem>>, vector<64x128xbf16>
    %c0_1 = arith.constant 0 : index
    %c0_2 = arith.constant 0 : index
    %1 = vector.load %arg2[%c0_1, %c0_2] : memref<128x128xbf16, #tpu.memory_space<vmem>>, vector<128x128xbf16>
    %cst = arith.constant dense<0.000000e+00> : vector<64x128xf32>
    %2 = tpu.matmul %0, %1, %cst {dimension_numbers = #tpu.dot_dimension_numbers<[1], [0], [0], [1], [0, 0, 1, 1], [], []>} : vector<64x128xbf16>, vector<128x128xbf16>, vector<64x128xf32> -> vector<64x128xf32>
    %c0_3 = arith.constant 0 : index
    %c0_4 = arith.constant 0 : index
    %3 = vector.load %arg3[%c0_3, %c0_4] : memref<1x128xf32, #tpu.memory_space<vmem>>, vector<1x128xf32>
    %4 = vector.broadcast %3 : vector<1x128xf32> to vector<64x128xf32>
    %5 = arith.addf %2, %4 : vector<64x128xf32>
    %cst_5 = arith.constant 1.000000e-01 : f32
    %6 = vector.broadcast %cst_5 : f32 to vector<64x128xf32>
    %7 = arith.mulf %6, %5 : vector<64x128xf32>
    %8 = arith.maximumf %5, %7 : vector<64x128xf32>
    %9 = arith.truncf %8 : vector<64x128xf32> to vector<64x128xbf16>
    %c0_6 = arith.constant 0 : index
    %c0_7 = arith.constant 0 : index
    %10 = vector.load %arg4[%c0_6, %c0_7] : memref<64x128xbf16, #tpu.memory_space<vmem>>, vector<64x128xbf16>
    tpu.vector_store %arg4[%c0_6, %c0_7], %9 {strides = array<i32>} : memref<64x128xbf16, #tpu.memory_space<vmem>>, vector<64x128xbf16>,
    return
  }
  func.func @transform_0(%arg0: i32) -> (i32, i32) {
    %c0_i32 = arith.constant 0 : i32
    %c0_i32_0 = arith.constant 0 : i32
    return %arg0, %c0_i32 : i32, i32
  }
  func.func @transform_1(%arg0: i32) -> (i32, i32) {
    %c0_i32 = arith.constant 0 : i32
    %c0_i32_0 = arith.constant 0 : i32
    %c0_i32_1 = arith.constant 0 : i32
    return %c0_i32, %c0_i32_0 : i32, i32
  }
  func.func @transform_2(%arg0: i32) -> (i32, i32) {
    %c0_i32 = arith.constant 0 : i32
    %c0_i32_0 = arith.constant 0 : i32
    %c0_i32_1 = arith.constant 0 : i32
    return %c0_i32, %c0_i32_0 : i32, i32
  }
  func.func @transform_3(%arg0: i32) -> (i32, i32) {
    %c0_i32 = arith.constant 0 : i32
    %c0_i32_0 = arith.constant 0 : i32
    return %arg0, %c0_i32 : i32, i32
  }
}

module attributes {stable_mosaic.version = 11 : i64} {
  func.func @_conv_gemm_res_kernel(%arg0: i32, %arg1: memref<64x128xbf16, #tpu.memory_space<vmem>>, %arg2: memref<128x128xbf16, #tpu.memory_space<vmem>>, %arg3: memref<1x128xf32, #tpu.memory_space<vmem>>, %arg4: memref<64x128xbf16, #tpu.memory_space<vmem>>, %arg5: memref<64x128xbf16, #tpu.memory_space<vmem>>) attributes {dimension_semantics = [#tpu.dimension_semantics<parallel>], iteration_bounds = array<i64: 2>, scalar_prefetch = 0 : i64, scratch_operands = 0 : i64, tpu.core_type = #tpu.core_type<tc>, window_params = [{transform_indices = @transform_0, window_bounds = array<i64: 64, 128>}, {pipeline_mode = #tpu.pipeline_mode<synchronous>, transform_indices = @transform_1, window_bounds = array<i64: 128, 128>}, {pipeline_mode = #tpu.pipeline_mode<synchronous>, transform_indices = @transform_2, window_bounds = array<i64: 1, 128>}, {transform_indices = @transform_3, window_bounds = array<i64: 64, 128>}, {transform_indices = @transform_4, window_bounds = array<i64: 64, 128>}]} {
    %c0 = arith.constant 0 : index
    %c0_0 = arith.constant 0 : index
    %0 = vector.load %arg1[%c0, %c0_0] : memref<64x128xbf16, #tpu.memory_space<vmem>>, vector<64x128xbf16>
    %c0_1 = arith.constant 0 : index
    %c0_2 = arith.constant 0 : index
    %1 = vector.load %arg2[%c0_1, %c0_2] : memref<128x128xbf16, #tpu.memory_space<vmem>>, vector<128x128xbf16>
    %cst = arith.constant dense<0.000000e+00> : vector<64x128xf32>
    %2 = tpu.matmul %0, %1, %cst {dimension_numbers = #tpu.dot_dimension_numbers<[1], [0], [0], [1], [0, 0, 1, 1], [], []>} : vector<64x128xbf16>, vector<128x128xbf16>, vector<64x128xf32> -> vector<64x128xf32>
    %c0_3 = arith.constant 0 : index
    %c0_4 = arith.constant 0 : index
    %3 = vector.load %arg3[%c0_3, %c0_4] : memref<1x128xf32, #tpu.memory_space<vmem>>, vector<1x128xf32>
    %4 = vector.broadcast %3 : vector<1x128xf32> to vector<64x128xf32>
    %5 = arith.addf %2, %4 : vector<64x128xf32>
    %cst_5 = arith.constant 1.000000e-01 : f32
    %6 = vector.broadcast %cst_5 : f32 to vector<64x128xf32>
    %7 = arith.mulf %6, %5 : vector<64x128xf32>
    %8 = arith.maximumf %5, %7 : vector<64x128xf32>
    %c0_6 = arith.constant 0 : index
    %c0_7 = arith.constant 0 : index
    %9 = vector.load %arg4[%c0_6, %c0_7] : memref<64x128xbf16, #tpu.memory_space<vmem>>, vector<64x128xbf16>
    %10 = arith.extf %9 : vector<64x128xbf16> to vector<64x128xf32>
    %11 = arith.addf %8, %10 : vector<64x128xf32>
    %12 = arith.truncf %11 : vector<64x128xf32> to vector<64x128xbf16>
    %c0_8 = arith.constant 0 : index
    %c0_9 = arith.constant 0 : index
    %13 = vector.load %arg5[%c0_8, %c0_9] : memref<64x128xbf16, #tpu.memory_space<vmem>>, vector<64x128xbf16>
    tpu.vector_store %arg5[%c0_8, %c0_9], %12 {strides = array<i32>} : memref<64x128xbf16, #tpu.memory_space<vmem>>, vector<64x128xbf16>,
    return
  }
  func.func @transform_0(%arg0: i32) -> (i32, i32) {
    %c0_i32 = arith.constant 0 : i32
    %c0_i32_0 = arith.constant 0 : i32
    return %arg0, %c0_i32 : i32, i32
  }
  func.func @transform_1(%arg0: i32) -> (i32, i32) {
    %c0_i32 = arith.constant 0 : i32
    %c0_i32_0 = arith.constant 0 : i32
    %c0_i32_1 = arith.constant 0 : i32
    return %c0_i32, %c0_i32_0 : i32, i32
  }
  func.func @transform_2(%arg0: i32) -> (i32, i32) {
    %c0_i32 = arith.constant 0 : i32
    %c0_i32_0 = arith.constant 0 : i32
    %c0_i32_1 = arith.constant 0 : i32
    return %c0_i32, %c0_i32_0 : i32, i32
  }
  func.func @transform_3(%arg0: i32) -> (i32, i32) {
    %c0_i32 = arith.constant 0 : i32
    %c0_i32_0 = arith.constant 0 : i32
    return %arg0, %c0_i32 : i32, i32
  }
  func.func @transform_4(%arg0: i32) -> (i32, i32) {
    %c0_i32 = arith.constant 0 : i32
    %c0_i32_0 = arith.constant 0 : i32
    return %arg0, %c0_i32 : i32, i32
  }
}

module attributes {stable_mosaic.version = 11 : i64} {
  func.func @_conv_gemm_kernel(%arg0: i32, %arg1: memref<32x256xbf16, #tpu.memory_space<vmem>>, %arg2: memref<256x128xbf16, #tpu.memory_space<vmem>>, %arg3: memref<1x128xf32, #tpu.memory_space<vmem>>, %arg4: memref<32x128xbf16, #tpu.memory_space<vmem>>) attributes {dimension_semantics = [#tpu.dimension_semantics<parallel>], iteration_bounds = array<i64: 1>, scalar_prefetch = 0 : i64, scratch_operands = 0 : i64, tpu.core_type = #tpu.core_type<tc>, window_params = [{transform_indices = @transform_0, window_bounds = array<i64: 32, 256>}, {pipeline_mode = #tpu.pipeline_mode<synchronous>, transform_indices = @transform_1, window_bounds = array<i64: 256, 128>}, {pipeline_mode = #tpu.pipeline_mode<synchronous>, transform_indices = @transform_2, window_bounds = array<i64: 1, 128>}, {transform_indices = @transform_3, window_bounds = array<i64: 32, 128>}]} {
    %c0 = arith.constant 0 : index
    %c0_0 = arith.constant 0 : index
    %0 = vector.load %arg1[%c0, %c0_0] : memref<32x256xbf16, #tpu.memory_space<vmem>>, vector<32x256xbf16>
    %c0_1 = arith.constant 0 : index
    %c0_2 = arith.constant 0 : index
    %1 = vector.load %arg2[%c0_1, %c0_2] : memref<256x128xbf16, #tpu.memory_space<vmem>>, vector<256x128xbf16>
    %cst = arith.constant dense<0.000000e+00> : vector<32x128xf32>
    %2 = tpu.matmul %0, %1, %cst {dimension_numbers = #tpu.dot_dimension_numbers<[1], [0], [0], [1], [0, 0, 1, 1], [], []>} : vector<32x256xbf16>, vector<256x128xbf16>, vector<32x128xf32> -> vector<32x128xf32>
    %c0_3 = arith.constant 0 : index
    %c0_4 = arith.constant 0 : index
    %3 = vector.load %arg3[%c0_3, %c0_4] : memref<1x128xf32, #tpu.memory_space<vmem>>, vector<1x128xf32>
    %4 = vector.broadcast %3 : vector<1x128xf32> to vector<32x128xf32>
    %5 = arith.addf %2, %4 : vector<32x128xf32>
    %cst_5 = arith.constant 1.000000e-01 : f32
    %6 = vector.broadcast %cst_5 : f32 to vector<32x128xf32>
    %7 = arith.mulf %6, %5 : vector<32x128xf32>
    %8 = arith.maximumf %5, %7 : vector<32x128xf32>
    %9 = arith.truncf %8 : vector<32x128xf32> to vector<32x128xbf16>
    %c0_6 = arith.constant 0 : index
    %c0_7 = arith.constant 0 : index
    %10 = vector.load %arg4[%c0_6, %c0_7] : memref<32x128xbf16, #tpu.memory_space<vmem>>, vector<32x128xbf16>
    tpu.vector_store %arg4[%c0_6, %c0_7], %9 {strides = array<i32>} : memref<32x128xbf16, #tpu.memory_space<vmem>>, vector<32x128xbf16>,
    return
  }
  func.func @transform_0(%arg0: i32) -> (i32, i32) {
    %c0_i32 = arith.constant 0 : i32
    %c0_i32_0 = arith.constant 0 : i32
    return %arg0, %c0_i32 : i32, i32
  }
  func.func @transform_1(%arg0: i32) -> (i32, i32) {
    %c0_i32 = arith.constant 0 : i32
    %c0_i32_0 = arith.constant 0 : i32
    %c0_i32_1 = arith.constant 0 : i32
    return %c0_i32, %c0_i32_0 : i32, i32
  }
  func.func @transform_2(%arg0: i32) -> (i32, i32) {
    %c0_i32 = arith.constant 0 : i32
    %c0_i32_0 = arith.constant 0 : i32
    %c0_i32_1 = arith.constant 0 : i32
    return %c0_i32, %c0_i32_0 : i32, i32
  }
  func.func @transform_3(%arg0: i32) -> (i32, i32) {
    %c0_i32 = arith.constant 0 : i32
    %c0_i32_0 = arith.constant 0 : i32
    return %arg0, %c0_i32 : i32, i32
  }
}

module attributes {stable_mosaic.version = 11 : i64} {
  func.func @_conv_gemm_kernel(%arg0: i32, %arg1: memref<32x128xbf16, #tpu.memory_space<vmem>>, %arg2: memref<128x128xbf16, #tpu.memory_space<vmem>>, %arg3: memref<1x128xf32, #tpu.memory_space<vmem>>, %arg4: memref<32x128xbf16, #tpu.memory_space<vmem>>) attributes {dimension_semantics = [#tpu.dimension_semantics<parallel>], iteration_bounds = array<i64: 1>, scalar_prefetch = 0 : i64, scratch_operands = 0 : i64, tpu.core_type = #tpu.core_type<tc>, window_params = [{transform_indices = @transform_0, window_bounds = array<i64: 32, 128>}, {pipeline_mode = #tpu.pipeline_mode<synchronous>, transform_indices = @transform_1, window_bounds = array<i64: 128, 128>}, {pipeline_mode = #tpu.pipeline_mode<synchronous>, transform_indices = @transform_2, window_bounds = array<i64: 1, 128>}, {transform_indices = @transform_3, window_bounds = array<i64: 32, 128>}]} {
    %c0 = arith.constant 0 : index
    %c0_0 = arith.constant 0 : index
    %0 = vector.load %arg1[%c0, %c0_0] : memref<32x128xbf16, #tpu.memory_space<vmem>>, vector<32x128xbf16>
    %c0_1 = arith.constant 0 : index
    %c0_2 = arith.constant 0 : index
    %1 = vector.load %arg2[%c0_1, %c0_2] : memref<128x128xbf16, #tpu.memory_space<vmem>>, vector<128x128xbf16>
    %cst = arith.constant dense<0.000000e+00> : vector<32x128xf32>
    %2 = tpu.matmul %0, %1, %cst {dimension_numbers = #tpu.dot_dimension_numbers<[1], [0], [0], [1], [0, 0, 1, 1], [], []>} : vector<32x128xbf16>, vector<128x128xbf16>, vector<32x128xf32> -> vector<32x128xf32>
    %c0_3 = arith.constant 0 : index
    %c0_4 = arith.constant 0 : index
    %3 = vector.load %arg3[%c0_3, %c0_4] : memref<1x128xf32, #tpu.memory_space<vmem>>, vector<1x128xf32>
    %4 = vector.broadcast %3 : vector<1x128xf32> to vector<32x128xf32>
    %5 = arith.addf %2, %4 : vector<32x128xf32>
    %cst_5 = arith.constant 1.000000e-01 : f32
    %6 = vector.broadcast %cst_5 : f32 to vector<32x128xf32>
    %7 = arith.mulf %6, %5 : vector<32x128xf32>
    %8 = arith.maximumf %5, %7 : vector<32x128xf32>
    %9 = arith.truncf %8 : vector<32x128xf32> to vector<32x128xbf16>
    %c0_6 = arith.constant 0 : index
    %c0_7 = arith.constant 0 : index
    %10 = vector.load %arg4[%c0_6, %c0_7] : memref<32x128xbf16, #tpu.memory_space<vmem>>, vector<32x128xbf16>
    tpu.vector_store %arg4[%c0_6, %c0_7], %9 {strides = array<i32>} : memref<32x128xbf16, #tpu.memory_space<vmem>>, vector<32x128xbf16>,
    return
  }
  func.func @transform_0(%arg0: i32) -> (i32, i32) {
    %c0_i32 = arith.constant 0 : i32
    %c0_i32_0 = arith.constant 0 : i32
    return %arg0, %c0_i32 : i32, i32
  }
  func.func @transform_1(%arg0: i32) -> (i32, i32) {
    %c0_i32 = arith.constant 0 : i32
    %c0_i32_0 = arith.constant 0 : i32
    %c0_i32_1 = arith.constant 0 : i32
    return %c0_i32, %c0_i32_0 : i32, i32
  }
  func.func @transform_2(%arg0: i32) -> (i32, i32) {
    %c0_i32 = arith.constant 0 : i32
    %c0_i32_0 = arith.constant 0 : i32
    %c0_i32_1 = arith.constant 0 : i32
    return %c0_i32, %c0_i32_0 : i32, i32
  }
  func.func @transform_3(%arg0: i32) -> (i32, i32) {
    %c0_i32 = arith.constant 0 : i32
    %c0_i32_0 = arith.constant 0 : i32
    return %arg0, %c0_i32 : i32, i32
  }
}

module attributes {stable_mosaic.version = 11 : i64} {
  func.func @_conv_gemm_kernel(%arg0: i32, %arg1: memref<32x128xbf16, #tpu.memory_space<vmem>>, %arg2: memref<128x128xbf16, #tpu.memory_space<vmem>>, %arg3: memref<1x128xf32, #tpu.memory_space<vmem>>, %arg4: memref<32x128xbf16, #tpu.memory_space<vmem>>) attributes {dimension_semantics = [#tpu.dimension_semantics<parallel>], iteration_bounds = array<i64: 1>, scalar_prefetch = 0 : i64, scratch_operands = 0 : i64, tpu.core_type = #tpu.core_type<tc>, window_params = [{transform_indices = @transform_0, window_bounds = array<i64: 32, 128>}, {pipeline_mode = #tpu.pipeline_mode<synchronous>, transform_indices = @transform_1, window_bounds = array<i64: 128, 128>}, {pipeline_mode = #tpu.pipeline_mode<synchronous>, transform_indices = @transform_2, window_bounds = array<i64: 1, 128>}, {transform_indices = @transform_3, window_bounds = array<i64: 32, 128>}]} {
    %c0 = arith.constant 0 : index
    %c0_0 = arith.constant 0 : index
    %0 = vector.load %arg1[%c0, %c0_0] : memref<32x128xbf16, #tpu.memory_space<vmem>>, vector<32x128xbf16>
    %c0_1 = arith.constant 0 : index
    %c0_2 = arith.constant 0 : index
    %1 = vector.load %arg2[%c0_1, %c0_2] : memref<128x128xbf16, #tpu.memory_space<vmem>>, vector<128x128xbf16>
    %cst = arith.constant dense<0.000000e+00> : vector<32x128xf32>
    %2 = tpu.matmul %0, %1, %cst {dimension_numbers = #tpu.dot_dimension_numbers<[1], [0], [0], [1], [0, 0, 1, 1], [], []>} : vector<32x128xbf16>, vector<128x128xbf16>, vector<32x128xf32> -> vector<32x128xf32>
    %c0_3 = arith.constant 0 : index
    %c0_4 = arith.constant 0 : index
    %3 = vector.load %arg3[%c0_3, %c0_4] : memref<1x128xf32, #tpu.memory_space<vmem>>, vector<1x128xf32>
    %4 = vector.broadcast %3 : vector<1x128xf32> to vector<32x128xf32>
    %5 = arith.addf %2, %4 : vector<32x128xf32>
    %6 = arith.truncf %5 : vector<32x128xf32> to vector<32x128xbf16>
    %c0_5 = arith.constant 0 : index
    %c0_6 = arith.constant 0 : index
    %7 = vector.load %arg4[%c0_5, %c0_6] : memref<32x128xbf16, #tpu.memory_space<vmem>>, vector<32x128xbf16>
    tpu.vector_store %arg4[%c0_5, %c0_6], %6 {strides = array<i32>} : memref<32x128xbf16, #tpu.memory_space<vmem>>, vector<32x128xbf16>,
    return
  }
  func.func @transform_0(%arg0: i32) -> (i32, i32) {
    %c0_i32 = arith.constant 0 : i32
    %c0_i32_0 = arith.constant 0 : i32
    return %arg0, %c0_i32 : i32, i32
  }
  func.func @transform_1(%arg0: i32) -> (i32, i32) {
    %c0_i32 = arith.constant 0 : i32
    %c0_i32_0 = arith.constant 0 : i32
    %c0_i32_1 = arith.constant 0 : i32
    return %c0_i32, %c0_i32_0 : i32, i32
  }
  func.func @transform_2(%arg0: i32) -> (i32, i32) {
    %c0_i32 = arith.constant 0 : i32
    %c0_i32_0 = arith.constant 0 : i32
    %c0_i32_1 = arith.constant 0 : i32
    return %c0_i32, %c0_i32_0 : i32, i32
  }
  func.func @transform_3(%arg0: i32) -> (i32, i32) {
    %c0_i32 = arith.constant 0 : i32
    %c0_i32_0 = arith.constant 0 : i32
    return %arg0, %c0_i32 : i32, i32
  }
}

module attributes {stable_mosaic.version = 11 : i64} {
  func.func @_yolo_decode_kernel(%arg0: i32, %arg1: memref<1x4x4x128xbf16, #tpu.memory_space<vmem>>, %arg2: memref<4x128xf32, #tpu.memory_space<vmem>>, %arg3: memref<1x4x4x128xf32, #tpu.memory_space<vmem>>) attributes {dimension_semantics = [#tpu.dimension_semantics<parallel>], iteration_bounds = array<i64: 2>, scalar_prefetch = 0 : i64, scratch_operands = 0 : i64, tpu.core_type = #tpu.core_type<tc>, window_params = [{transform_indices = @transform_0, window_bounds = array<i64: 1, 4, 4, 128>}, {pipeline_mode = #tpu.pipeline_mode<synchronous>, transform_indices = @transform_1, window_bounds = array<i64: 4, 128>}, {transform_indices = @transform_2, window_bounds = array<i64: 1, 4, 4, 128>}]} {
    %c0 = arith.constant 0 : index
    %c0_0 = arith.constant 0 : index
    %c0_1 = arith.constant 0 : index
    %c0_2 = arith.constant 0 : index
    %0 = vector.load %arg1[%c0, %c0_0, %c0_1, %c0_2] : memref<1x4x4x128xbf16, #tpu.memory_space<vmem>>, vector<1x4x4x128xbf16>
    %1 = arith.extf %0 : vector<1x4x4x128xbf16> to vector<1x4x4x128xf32>
    %c0_3 = arith.constant 0 : index
    %c0_4 = arith.constant 0 : index
    %2 = vector.load %arg2[%c0_3, %c0_4] : memref<4x128xf32, #tpu.memory_space<vmem>>, vector<4x128xf32>
    %3 = vector.extract_strided_slice %2 {offsets = [0, 0], sizes = [1, 128], strides = [1, 1]} : vector<4x128xf32> to vector<1x128xf32>
    %4 = vector.extract_strided_slice %2 {offsets = [1, 0], sizes = [1, 128], strides = [1, 1]} : vector<4x128xf32> to vector<1x128xf32>
    %5 = vector.extract_strided_slice %2 {offsets = [2, 0], sizes = [1, 128], strides = [1, 1]} : vector<4x128xf32> to vector<1x128xf32>
    %6 = vector.extract_strided_slice %2 {offsets = [3, 0], sizes = [1, 128], strides = [1, 1]} : vector<4x128xf32> to vector<1x128xf32>
    %7 = tpu.iota {dimensions = array<i32: 2>} : vector<1x4x4x128xi32>
    %8 = arith.sitofp %7 : vector<1x4x4x128xi32> to vector<1x4x4x128xf32>
    %9 = tpu.iota {dimensions = array<i32: 1>} : vector<1x4x4x128xi32>
    %10 = arith.sitofp %9 : vector<1x4x4x128xi32> to vector<1x4x4x128xf32>
    %cst = arith.constant 0.000000e+00 : f32
    %11 = vector.broadcast %cst : f32 to vector<1x4x4x128xf32>
    %12 = arith.subf %11, %1 : vector<1x4x4x128xf32>
    %13 = math.exp %12 : vector<1x4x4x128xf32>
    %cst_5 = arith.constant 1.000000e+00 : f32
    %14 = vector.broadcast %cst_5 : f32 to vector<1x4x4x128xf32>
    %15 = arith.addf %14, %13 : vector<1x4x4x128xf32>
    %cst_6 = arith.constant 1.000000e+00 : f32
    %16 = vector.broadcast %cst_6 : f32 to vector<1x4x4x128xf32>
    %17 = arith.divf %16, %15 : vector<1x4x4x128xf32>
    %18 = math.exp %1 : vector<1x4x4x128xf32>
    %cst_7 = arith.constant 5.000000e-01 : f32
    %19 = vector.broadcast %cst_7 : f32 to vector<1x128xf32>
    %20 = arith.cmpf ogt, %5, %19 : vector<1x128xf32>
    %21 = vector.shape_cast %20 : vector<1x128xi1> to vector<1x1x1x128xi1>
    %22 = vector.broadcast %21 : vector<1x1x1x128xi1> to vector<1x4x4x128xi1>
    %23 = arith.select %22, %18, %17 : vector<1x4x4x128xi1>, vector<1x4x4x128xf32>
    %24 = vector.shape_cast %3 : vector<1x128xf32> to vector<1x1x1x128xf32>
    %25 = vector.broadcast %24 : vector<1x1x1x128xf32> to vector<1x4x4x128xf32>
    %26 = arith.mulf %25, %8 : vector<1x4x4x128xf32>
    %27 = arith.addf %23, %26 : vector<1x4x4x128xf32>
    %28 = vector.shape_cast %4 : vector<1x128xf32> to vector<1x1x1x128xf32>
    %29 = vector.broadcast %28 : vector<1x1x1x128xf32> to vector<1x4x4x128xf32>
    %30 = arith.mulf %29, %10 : vector<1x4x4x128xf32>
    %31 = arith.addf %27, %30 : vector<1x4x4x128xf32>
    %32 = vector.shape_cast %6 : vector<1x128xf32> to vector<1x1x1x128xf32>
    %33 = vector.broadcast %32 : vector<1x1x1x128xf32> to vector<1x4x4x128xf32>
    %34 = arith.mulf %31, %33 : vector<1x4x4x128xf32>
    %c0_8 = arith.constant 0 : index
    %c0_9 = arith.constant 0 : index
    %c0_10 = arith.constant 0 : index
    %c0_11 = arith.constant 0 : index
    %35 = vector.load %arg3[%c0_8, %c0_9, %c0_10, %c0_11] : memref<1x4x4x128xf32, #tpu.memory_space<vmem>>, vector<1x4x4x128xf32>
    tpu.vector_store %arg3[%c0_8, %c0_9, %c0_10, %c0_11], %34 {strides = array<i32>} : memref<1x4x4x128xf32, #tpu.memory_space<vmem>>, vector<1x4x4x128xf32>,
    return
  }
  func.func @transform_0(%arg0: i32) -> (i32, i32, i32, i32) {
    %c0_i32 = arith.constant 0 : i32
    %c0_i32_0 = arith.constant 0 : i32
    %c0_i32_1 = arith.constant 0 : i32
    %c0_i32_2 = arith.constant 0 : i32
    return %arg0, %c0_i32, %c0_i32_0, %c0_i32_1 : i32, i32, i32, i32
  }
  func.func @transform_1(%arg0: i32) -> (i32, i32) {
    %c0_i32 = arith.constant 0 : i32
    %c0_i32_0 = arith.constant 0 : i32
    %c0_i32_1 = arith.constant 0 : i32
    return %c0_i32, %c0_i32_0 : i32, i32
  }
  func.func @transform_2(%arg0: i32) -> (i32, i32, i32, i32) {
    %c0_i32 = arith.constant 0 : i32
    %c0_i32_0 = arith.constant 0 : i32
    %c0_i32_1 = arith.constant 0 : i32
    %c0_i32_2 = arith.constant 0 : i32
    return %arg0, %c0_i32, %c0_i32_0, %c0_i32_1 : i32, i32, i32, i32
  }
}

module attributes {stable_mosaic.version = 11 : i64} {
  func.func @_conv_gemm_kernel(%arg0: i32, %arg1: memref<64x128xbf16, #tpu.memory_space<vmem>>, %arg2: memref<128x128xbf16, #tpu.memory_space<vmem>>, %arg3: memref<1x128xf32, #tpu.memory_space<vmem>>, %arg4: memref<64x128xbf16, #tpu.memory_space<vmem>>) attributes {dimension_semantics = [#tpu.dimension_semantics<parallel>], iteration_bounds = array<i64: 2>, scalar_prefetch = 0 : i64, scratch_operands = 0 : i64, tpu.core_type = #tpu.core_type<tc>, window_params = [{transform_indices = @transform_0, window_bounds = array<i64: 64, 128>}, {pipeline_mode = #tpu.pipeline_mode<synchronous>, transform_indices = @transform_1, window_bounds = array<i64: 128, 128>}, {pipeline_mode = #tpu.pipeline_mode<synchronous>, transform_indices = @transform_2, window_bounds = array<i64: 1, 128>}, {transform_indices = @transform_3, window_bounds = array<i64: 64, 128>}]} {
    %c0 = arith.constant 0 : index
    %c0_0 = arith.constant 0 : index
    %0 = vector.load %arg1[%c0, %c0_0] : memref<64x128xbf16, #tpu.memory_space<vmem>>, vector<64x128xbf16>
    %c0_1 = arith.constant 0 : index
    %c0_2 = arith.constant 0 : index
    %1 = vector.load %arg2[%c0_1, %c0_2] : memref<128x128xbf16, #tpu.memory_space<vmem>>, vector<128x128xbf16>
    %cst = arith.constant dense<0.000000e+00> : vector<64x128xf32>
    %2 = tpu.matmul %0, %1, %cst {dimension_numbers = #tpu.dot_dimension_numbers<[1], [0], [0], [1], [0, 0, 1, 1], [], []>} : vector<64x128xbf16>, vector<128x128xbf16>, vector<64x128xf32> -> vector<64x128xf32>
    %c0_3 = arith.constant 0 : index
    %c0_4 = arith.constant 0 : index
    %3 = vector.load %arg3[%c0_3, %c0_4] : memref<1x128xf32, #tpu.memory_space<vmem>>, vector<1x128xf32>
    %4 = vector.broadcast %3 : vector<1x128xf32> to vector<64x128xf32>
    %5 = arith.addf %2, %4 : vector<64x128xf32>
    %6 = arith.truncf %5 : vector<64x128xf32> to vector<64x128xbf16>
    %c0_5 = arith.constant 0 : index
    %c0_6 = arith.constant 0 : index
    %7 = vector.load %arg4[%c0_5, %c0_6] : memref<64x128xbf16, #tpu.memory_space<vmem>>, vector<64x128xbf16>
    tpu.vector_store %arg4[%c0_5, %c0_6], %6 {strides = array<i32>} : memref<64x128xbf16, #tpu.memory_space<vmem>>, vector<64x128xbf16>,
    return
  }
  func.func @transform_0(%arg0: i32) -> (i32, i32) {
    %c0_i32 = arith.constant 0 : i32
    %c0_i32_0 = arith.constant 0 : i32
    return %arg0, %c0_i32 : i32, i32
  }
  func.func @transform_1(%arg0: i32) -> (i32, i32) {
    %c0_i32 = arith.constant 0 : i32
    %c0_i32_0 = arith.constant 0 : i32
    %c0_i32_1 = arith.constant 0 : i32
    return %c0_i32, %c0_i32_0 : i32, i32
  }
  func.func @transform_2(%arg0: i32) -> (i32, i32) {
    %c0_i32 = arith.constant 0 : i32
    %c0_i32_0 = arith.constant 0 : i32
    %c0_i32_1 = arith.constant 0 : i32
    return %c0_i32, %c0_i32_0 : i32, i32
  }
  func.func @transform_3(%arg0: i32) -> (i32, i32) {
    %c0_i32 = arith.constant 0 : i32
    %c0_i32_0 = arith.constant 0 : i32
    return %arg0, %c0_i32 : i32, i32
  }
}

module attributes {stable_mosaic.version = 11 : i64} {
  func.func @_yolo_decode_kernel(%arg0: i32, %arg1: memref<1x8x8x128xbf16, #tpu.memory_space<vmem>>, %arg2: memref<4x128xf32, #tpu.memory_space<vmem>>, %arg3: memref<1x8x8x128xf32, #tpu.memory_space<vmem>>) attributes {dimension_semantics = [#tpu.dimension_semantics<parallel>], iteration_bounds = array<i64: 2>, scalar_prefetch = 0 : i64, scratch_operands = 0 : i64, tpu.core_type = #tpu.core_type<tc>, window_params = [{transform_indices = @transform_0, window_bounds = array<i64: 1, 8, 8, 128>}, {pipeline_mode = #tpu.pipeline_mode<synchronous>, transform_indices = @transform_1, window_bounds = array<i64: 4, 128>}, {transform_indices = @transform_2, window_bounds = array<i64: 1, 8, 8, 128>}]} {
    %c0 = arith.constant 0 : index
    %c0_0 = arith.constant 0 : index
    %c0_1 = arith.constant 0 : index
    %c0_2 = arith.constant 0 : index
    %0 = vector.load %arg1[%c0, %c0_0, %c0_1, %c0_2] : memref<1x8x8x128xbf16, #tpu.memory_space<vmem>>, vector<1x8x8x128xbf16>
    %1 = arith.extf %0 : vector<1x8x8x128xbf16> to vector<1x8x8x128xf32>
    %c0_3 = arith.constant 0 : index
    %c0_4 = arith.constant 0 : index
    %2 = vector.load %arg2[%c0_3, %c0_4] : memref<4x128xf32, #tpu.memory_space<vmem>>, vector<4x128xf32>
    %3 = vector.extract_strided_slice %2 {offsets = [0, 0], sizes = [1, 128], strides = [1, 1]} : vector<4x128xf32> to vector<1x128xf32>
    %4 = vector.extract_strided_slice %2 {offsets = [1, 0], sizes = [1, 128], strides = [1, 1]} : vector<4x128xf32> to vector<1x128xf32>
    %5 = vector.extract_strided_slice %2 {offsets = [2, 0], sizes = [1, 128], strides = [1, 1]} : vector<4x128xf32> to vector<1x128xf32>
    %6 = vector.extract_strided_slice %2 {offsets = [3, 0], sizes = [1, 128], strides = [1, 1]} : vector<4x128xf32> to vector<1x128xf32>
    %7 = tpu.iota {dimensions = array<i32: 2>} : vector<1x8x8x128xi32>
    %8 = arith.sitofp %7 : vector<1x8x8x128xi32> to vector<1x8x8x128xf32>
    %9 = tpu.iota {dimensions = array<i32: 1>} : vector<1x8x8x128xi32>
    %10 = arith.sitofp %9 : vector<1x8x8x128xi32> to vector<1x8x8x128xf32>
    %cst = arith.constant 0.000000e+00 : f32
    %11 = vector.broadcast %cst : f32 to vector<1x8x8x128xf32>
    %12 = arith.subf %11, %1 : vector<1x8x8x128xf32>
    %13 = math.exp %12 : vector<1x8x8x128xf32>
    %cst_5 = arith.constant 1.000000e+00 : f32
    %14 = vector.broadcast %cst_5 : f32 to vector<1x8x8x128xf32>
    %15 = arith.addf %14, %13 : vector<1x8x8x128xf32>
    %cst_6 = arith.constant 1.000000e+00 : f32
    %16 = vector.broadcast %cst_6 : f32 to vector<1x8x8x128xf32>
    %17 = arith.divf %16, %15 : vector<1x8x8x128xf32>
    %18 = math.exp %1 : vector<1x8x8x128xf32>
    %cst_7 = arith.constant 5.000000e-01 : f32
    %19 = vector.broadcast %cst_7 : f32 to vector<1x128xf32>
    %20 = arith.cmpf ogt, %5, %19 : vector<1x128xf32>
    %21 = vector.shape_cast %20 : vector<1x128xi1> to vector<1x1x1x128xi1>
    %22 = vector.broadcast %21 : vector<1x1x1x128xi1> to vector<1x8x8x128xi1>
    %23 = arith.select %22, %18, %17 : vector<1x8x8x128xi1>, vector<1x8x8x128xf32>
    %24 = vector.shape_cast %3 : vector<1x128xf32> to vector<1x1x1x128xf32>
    %25 = vector.broadcast %24 : vector<1x1x1x128xf32> to vector<1x8x8x128xf32>
    %26 = arith.mulf %25, %8 : vector<1x8x8x128xf32>
    %27 = arith.addf %23, %26 : vector<1x8x8x128xf32>
    %28 = vector.shape_cast %4 : vector<1x128xf32> to vector<1x1x1x128xf32>
    %29 = vector.broadcast %28 : vector<1x1x1x128xf32> to vector<1x8x8x128xf32>
    %30 = arith.mulf %29, %10 : vector<1x8x8x128xf32>
    %31 = arith.addf %27, %30 : vector<1x8x8x128xf32>
    %32 = vector.shape_cast %6 : vector<1x128xf32> to vector<1x1x1x128xf32>
    %33 = vector.broadcast %32 : vector<1x1x1x128xf32> to vector<1x8x8x128xf32>
    %34 = arith.mulf %31, %33 : vector<1x8x8x128xf32>
    %c0_8 = arith.constant 0 : index
    %c0_9 = arith.constant 0 : index
    %c0_10 = arith.constant 0 : index
    %c0_11 = arith.constant 0 : index
    %35 = vector.load %arg3[%c0_8, %c0_9, %c0_10, %c0_11] : memref<1x8x8x128xf32, #tpu.memory_space<vmem>>, vector<1x8x8x128xf32>
    tpu.vector_store %arg3[%c0_8, %c0_9, %c0_10, %c0_11], %34 {strides = array<i32>} : memref<1x8x8x128xf32, #tpu.memory_space<vmem>>, vector<1x8x8x128xf32>,
    return
  }
  func.func @transform_0(%arg0: i32) -> (i32, i32, i32, i32) {
    %c0_i32 = arith.constant 0 : i32
    %c0_i32_0 = arith.constant 0 : i32
    %c0_i32_1 = arith.constant 0 : i32
    %c0_i32_2 = arith.constant 0 : i32
    return %arg0, %c0_i32, %c0_i32_0, %c0_i32_1 : i32, i32, i32, i32
  }
  func.func @transform_1(%arg0: i32) -> (i32, i32) {
    %c0_i32 = arith.constant 0 : i32
    %c0_i32_0 = arith.constant 0 : i32
    %c0_i32_1 = arith.constant 0 : i32
    return %c0_i32, %c0_i32_0 : i32, i32
  }
  func.func @transform_2(%arg0: i32) -> (i32, i32, i32, i32) {
    %c0_i32 = arith.constant 0 : i32
    %c0_i32_0 = arith.constant 0 : i32
    %c0_i32_1 = arith.constant 0 : i32
    %c0_i32_2 = arith.constant 0 : i32
    return %arg0, %c0_i32, %c0_i32_0, %c0_i32_1 : i32, i32, i32, i32
  }
}

</mosaic_0001>

<bundles_post_ra>
// kernel: _lambda_.10
= control target key start
LH: loop header
LB: loop body
LE: loop exit
PB: predicated region body
PF: predicated region fallthrough
CT: control target
= control target key end

     0   :  { %s798_s12 = smov 0   ;;  %s869_s0 = inlined_call_operand.vmem [shape: bf16[512,128], index: 0, kind: input, shape index: {}]   ;;  %s870_s1 = inlined_call_operand.vmem [shape: bf16[128,128], index: 1, kind: input, shape index: {}]   ;;  %s871_s2 = inlined_call_operand.vmem [shape: f32[1,128], index: 2, kind: input, shape index: {}]   ;;  %s872_s3 = inlined_call_operand.vmem [shape: bf16[512,128], index: 3, kind: output, shape index: {}]  }
   0x1 LB: > { %s575_s13 = sadd.s32 4294967295, %s776_s12   ;;  %p579_p0 = scmp.ge.s32.totalorder %s776_s12, 1  ;;  %s776_s12 = sphi %s798_s12, %s13_s12  }
   0x2   : > { %p138_p1 = scmp.lt.s32.totalorder %s776_s12, 5 }
   0x4   : > { %p139_p2 = pnand %p579_p0, %p138_p1 }
   0x5   : > { %s580_s16 = sshll.u32 (!%p139_p2), %s575_s13, 4 }
   0x6   : > { %142 = sbr.rel (%p139_p2) target bundleno = 260 (0x104), region = 32  ;;  %p163_p3 = scmp.lt.s32.totalorder (!%p139_p2), %s580_s16, 63 }
   0xb   : > { %v754_v0 = vld [vmem:[%s870_s1 + $0x38] sm:$0xff]   ;;  %v755_v1 = vld [vmem:[%s870_s1 + $0x30] sm:$0xff]   ;;  %s874_s16 = smov (!%p163_p3, %s580_s16), 63  ;;  %v756_v2 = vld [vmem:[%s870_s1 + $0x28] sm:$0xff]  }
   0xc   : > { %698 = vmatprep.subr.bf16.mxu0 %v754_v0  ;;  %730 = vmatprep.subr.bf16.mxu1 %v754_v0  ;;  %s581_s21 = sshll.u32 %s874_s16, 2  ;;  %v757_v3 = vld [vmem:[%s870_s1 + $0x20] sm:$0xff]   ;;  %v758_v6 = vld [vmem:[%s870_s1 + $0x18] sm:$0xff]   ;;  %v759_v7 = vld [vmem:[%s870_s1 + $0x10] sm:$0xff]  }
   0xd   : > { %699 = vmatpush3.bf16.msra.mxu0 %v754_v0  ;;  %738 = vmatpush3.bf16.msra.mxu1 %v754_v0  ;;  %s823_s24 = scalar_lea.vmem %s869_s0, %s581_s21  ;;  %v760_v8 = vld [vmem:[%s870_s1 + $0x8] sm:$0xff]   ;;  %v761_v9 = vld [vmem:[%s870_s1] sm:$0xff]   ;;  %s856_s13 = scalar_lea.vmem %s872_s3, %s581_s21 }
   0xe   : > { %700 = vmatprep.subr.bf16.mxu0 %v755_v1  ;;  %731 = vmatprep.subr.bf16.mxu1 %v755_v1  ;;  %v762_v4 = vld [vmem:[%s823_s24] sm:$0xff]   ;;  %v764_v10 = vld [vmem:[%s823_s24 + $0x8] sm:$0xff]   ;;  %v766_v12 = vld [vmem:[%s823_s24 + $0x10] sm:$0xff]  }
   0xf   : > { %v763_v5 = vld [vmem:[%s823_s24 + $0x20] sm:$0xff]   ;;  %714 = vmatprep.mubr.bf16.mxu0 %v762_v4  ;;  %v765_v11 = vld [vmem:[%s823_s24 + $0x28] sm:$0xff]   ;;  %v767_v13 = vld [vmem:[%s823_s24 + $0x30] sm:$0xff]  }
  0x10   : > { %722 = vmatprep.mubr.bf16.mxu1 %v763_v5  ;;  %v768_v14 = vld [vmem:[%s823_s24 + $0x18] sm:$0xff]   ;;  %v584_v16 = vld [vmem:[%s871_s2] ss:$0 sm:$0xff] }
  0x11   : > { %701 = vmatpush3.bf16.msra.mxu0 %v755_v1  ;;  %739 = vmatpush3.bf16.msra.mxu1 %v755_v1  ;;  %v769_v15 = vld [vmem:[%s823_s24 + $0x38] sm:$0xff]  }
  0x12   : > { %702 = vmatprep.subr.bf16.mxu0 %v756_v2  ;;  %732 = vmatprep.subr.bf16.mxu1 %v756_v2 }
  0x15   : > { %703 = vmatpush3.bf16.msra.mxu0 %v756_v2  ;;  %740 = vmatpush3.bf16.msra.mxu1 %v756_v2 }
  0x16   : > { %704 = vmatprep.subr.bf16.mxu0 %v757_v3  ;;  %733 = vmatprep.subr.bf16.mxu1 %v757_v3 }
  0x19   : > { %705 = vmatpush3.bf16.msra.mxu0 %v757_v3  ;;  %741 = vmatpush3.bf16.msra.mxu1 %v757_v3 }
  0x1a   : > { %706 = vmatprep.subr.bf16.mxu0 %v758_v6  ;;  %734 = vmatprep.subr.bf16.mxu1 %v758_v6 }
  0x1d   : > { %707 = vmatpush3.bf16.msra.mxu0 %v758_v6  ;;  %742 = vmatpush3.bf16.msra.mxu1 %v758_v6 }
  0x1e   : > { %708 = vmatprep.subr.bf16.mxu0 %v759_v7  ;;  %735 = vmatprep.subr.bf16.mxu1 %v759_v7 }
  0x21   : > { %709 = vmatpush3.bf16.msra.mxu0 %v759_v7  ;;  %743 = vmatpush3.bf16.msra.mxu1 %v759_v7 }
  0x22   : > { %710 = vmatprep.subr.bf16.mxu0 %v760_v8  ;;  %736 = vmatprep.subr.bf16.mxu1 %v760_v8 }
  0x25   : > { %711 = vmatpush3.bf16.msra.mxu0 %v760_v8  ;;  %744 = vmatpush3.bf16.msra.mxu1 %v760_v8 }
  0x26   : > { %712 = vmatprep.subr.bf16.mxu0 %v761_v9  ;;  %737 = vmatprep.subr.bf16.mxu1 %v761_v9 }
  0x29   : > { %713 = vmatpush3.bf16.msra.mxu0 %v761_v9  ;;  %745 = vmatpush3.bf16.msra.mxu1 %v761_v9 }
  0x2c   : > { %715 = vmatmul.mubr.bf16.vlgmr.msra.gmra.mxu0 %v764_v10  ;;  %723 = vmatmul.mubr.bf16.vlgmr.msra.gmra.mxu1 %v765_v11 }
  0x2d   : > { %718 = vmatprep.mubr.bf16.mxu0 %v766_v12  ;;  %726 = vmatprep.mubr.bf16.mxu1 %v767_v13 }
  0x34   : > { %719 = vmatmul.mubr.bf16.gmra.mxu0 %v768_v14  ;;  %727 = vmatmul.mubr.bf16.gmra.mxu1 %v769_v15 }
  0xec   : > { %v716_v17 = vpop.f32.mrf.mxu0  ;;  %v724_v18 = vpop.f32.mrf.mxu1 }
  0xed   : > { %v353_v19 = vadd.f32 %v716_v17, %v584_v16  ;;  %v385_v20 = vadd.f32 %v724_v18, %v584_v16 }
  0xee   : > { %v344_v21 = vpop.f32.mrf.mxu0  ;;  %v376_v22 = vpop.f32.mrf.mxu1 }
  0xef   : > { %v345_v23 = vadd.f32 %v584_v16, %v344_v21  ;;  %v377_v24 = vadd.f32 %v584_v16, %v376_v22  ;;  %v409_v27 = vmul.f32 0.1, %v353_v19  ;;  %v417_v28 = vmul.f32 0.1, %v385_v20 }
  0xf0   : > { %v717_v25 = vpop.f32.mrf.mxu0  ;;  %v725_v26 = vpop.f32.mrf.mxu1 }
  0xf1   : > { %v356_v29 = vadd.f32 %v717_v25, %v584_v16  ;;  %v388_v30 = vadd.f32 %v725_v26, %v584_v16  ;;  %v407_v33 = vmul.f32 0.1, %v345_v23  ;;  %v415_v34 = vmul.f32 0.1, %v377_v24 }
  0xf2   : > { %v347_v31 = vpop.f32.mrf.mxu0  ;;  %v379_v32 = vpop.f32.mrf.mxu1  ;;  %v425_v41 = vmax.f32 %v353_v19, %v409_v27  ;;  %v433_v42 = vmax.f32 %v385_v20, %v417_v28 }
  0xf3   : > { %v348_v35 = vadd.f32 %v584_v16, %v347_v31  ;;  %v380_v36 = vadd.f32 %v584_v16, %v379_v32  ;;  %v410_v37 = vmul.f32 0.1, %v356_v29  ;;  %v418_v38 = vmul.f32 0.1, %v388_v30 }
  0xf4   : > { %v720_v39 = vpop.f32.mrf.mxu0  ;;  %v728_v40 = vpop.f32.mrf.mxu1  ;;  %v423_v51 = vmax.f32 %v345_v23, %v407_v33  ;;  %v431_v52 = vmax.f32 %v377_v24, %v415_v34 }
  0xf5   : > { %v408_v43 = vmul.f32 0.1, %v348_v35  ;;  %v416_v44 = vmul.f32 0.1, %v380_v36  ;;  %v426_v45 = vmax.f32 %v356_v29, %v410_v37  ;;  %v434_v46 = vmax.f32 %v388_v30, %v418_v38 }
  0xf6   : > { %v369_v47 = vadd.f32 %v720_v39, %v584_v16  ;;  %v401_v48 = vadd.f32 %v728_v40, %v584_v16  ;;  %v360_v49 = vpop.f32.mrf.mxu0  ;;  %v392_v50 = vpop.f32.mrf.mxu1 }
  0xf7   : > { %v424_v53 = vmax.f32 %v348_v35, %v408_v43  ;;  %v432_v54 = vmax.f32 %v380_v36, %v416_v44  ;;  %v643_v55 = vpack.c.bf16 %v426_v45, %v425_v41  ;;  %v663_v56 = vpack.c.bf16 %v434_v46, %v433_v42 }
  0xf8   : > { %v361_v57 = vadd.f32 %v584_v16, %v360_v49  ;;  %v393_v58 = vadd.f32 %v584_v16, %v392_v50  ;;  %v721_v59 = vpop.f32.mrf.mxu0  ;;  %v729_v60 = vpop.f32.mrf.mxu1  ;;  %v413_v63 = vmul.f32 0.1, %v369_v47  ;;  %v421_v0 = vmul.f32 0.1, %v401_v48 }
  0xf9   : > { %v638_v61 = vpack.c.bf16 %v424_v53, %v423_v51  ;;  %v658_v62 = vpack.c.bf16 %v432_v54, %v431_v52  ;;  %675 = vst [vmem:[%s856_s13 + $0x8] sm:$0xff] %v643_v55   ;;  %679 = vst [vmem:[%s856_s13 + $0x28] sm:$0xff] %v663_v56   ;;  %v372_v1 = vadd.f32 %v721_v59, %v584_v16 }
  0xfa   : > { %v404_v2 = vadd.f32 %v729_v60, %v584_v16  ;;  %v363_v3 = vpop.f32.mrf.mxu0  ;;  %v395_v4 = vpop.f32.mrf.mxu1  ;;  %v411_v5 = vmul.f32 0.1, %v361_v57  ;;  %v419_v6 = vmul.f32 0.1, %v393_v58  ;;  %v429_v13 = vmax.f32 %v369_v47, %v413_v63 }
  0xfb   : > { %639 = vst [vmem:[%s856_s13] sm:$0xff] %v638_v61   ;;  %678 = vst [vmem:[%s856_s13 + $0x20] sm:$0xff] %v658_v62   ;;  %v364_v7 = vadd.f32 %v584_v16, %v363_v3  ;;  %v396_v8 = vadd.f32 %v584_v16, %v395_v4  ;;  %v414_v9 = vmul.f32 0.1, %v372_v1  ;;  %v437_v14 = vmax.f32 %v401_v48, %v421_v0 }
  0xfc   : > { %v422_v10 = vmul.f32 0.1, %v404_v2  ;;  %v427_v18 = vmax.f32 %v361_v57, %v411_v5  ;;  %v435_v19 = vmax.f32 %v393_v58, %v419_v6 }
  0xfd   : > { %v412_v11 = vmul.f32 0.1, %v364_v7  ;;  %v420_v12 = vmul.f32 0.1, %v396_v8  ;;  %v430_v15 = vmax.f32 %v372_v1, %v414_v9 }
  0xfe   : > { %v438_v17 = vmax.f32 %v404_v2, %v422_v10 }
  0xff   : > { %v428_v20 = vmax.f32 %v364_v7, %v412_v11  ;;  %v436_v21 = vmax.f32 %v396_v8, %v420_v12  ;;  %v653_v22 = vpack.c.bf16 %v430_v15, %v429_v13 }
 0x100   : > { %v673_v23 = vpack.c.bf16 %v438_v17, %v437_v14 }
 0x101   : > { %v648_v24 = vpack.c.bf16 %v428_v20, %v427_v18  ;;  %v668_v16 = vpack.c.bf16 %v436_v21, %v435_v19  ;;  %677 = vst [vmem:[%s856_s13 + $0x18] sm:$0xff] %v653_v22  }
 0x102   : > { %681 = vst [vmem:[%s856_s13 + $0x38] sm:$0xff] %v673_v23  }
 0x103   : > { %676 = vst [vmem:[%s856_s13 + $0x10] sm:$0xff] %v648_v24   ;;  %680 = vst [vmem:[%s856_s13 + $0x30] sm:$0xff] %v668_v16  }
 0x104 PF: > { %s13_s12 = sadd.s32 1, %s776_s12  }
 0x105   : > { %p10_p4 = scmp.ge.s32.totalorder %s13_s12, 6  }
 0x107   :  { %12 = sbr.rel (!%p10_p4) target bundleno = 1 (0x1), region = 62 }

// kernel: _lambda_.11
= control target key start
LH: loop header
LB: loop body
LE: loop exit
PB: predicated region body
PF: predicated region fallthrough
CT: control target
= control target key end

     0   :  { %s618_s12 = smov 0   ;;  %s675_s0 = inlined_call_operand.vmem [shape: bf16[128,128], index: 0, kind: input, shape index: {}]   ;;  %s676_s1 = inlined_call_operand.vmem [shape: bf16[128,128], index: 1, kind: input, shape index: {}]   ;;  %s677_s2 = inlined_call_operand.vmem [shape: f32[1,128], index: 2, kind: input, shape index: {}]   ;;  %s678_s3 = inlined_call_operand.vmem [shape: bf16[128,128], index: 3, kind: output, shape index: {}]  }
   0x1 LB: > { %s455_s13 = sadd.s32 4294967295, %s596_s12   ;;  %p459_p0 = scmp.ge.s32.totalorder %s596_s12, 1  ;;  %s596_s12 = sphi %s618_s12, %s13_s12  }
   0x2   : > { %p138_p1 = scmp.lt.s32.totalorder %s596_s12, 3 }
   0x4   : > { %p139_p2 = pnand %p459_p0, %p138_p1 }
   0x5   : > { %s460_s16 = sshll.u32 (!%p139_p2), %s455_s13, 3 }
   0x6   : > { %142 = sbr.rel (%p139_p2) target bundleno = 252 (0xfc), region = 32  ;;  %p163_p3 = scmp.lt.s32.totalorder (!%p139_p2), %s460_s16, 15 }
   0xb   : > { %v578_v0 = vld [vmem:[%s676_s1 + $0x38] sm:$0xff]   ;;  %v579_v1 = vld [vmem:[%s676_s1 + $0x30] sm:$0xff]   ;;  %s680_s16 = smov (!%p163_p3, %s460_s16), 15  ;;  %v580_v2 = vld [vmem:[%s676_s1 + $0x28] sm:$0xff]  }
   0xc   : > { %530 = vmatprep.subr.bf16.mxu0 %v578_v0  ;;  %554 = vmatprep.subr.bf16.mxu1 %v578_v0  ;;  %s461_s21 = sshll.u32 %s680_s16, 2  ;;  %v581_v3 = vld [vmem:[%s676_s1 + $0x20] sm:$0xff]   ;;  %v582_v6 = vld [vmem:[%s676_s1 + $0x18] sm:$0xff]   ;;  %v583_v7 = vld [vmem:[%s676_s1 + $0x10] sm:$0xff]  }
   0xd   : > { %531 = vmatpush3.bf16.msra.mxu0 %v578_v0  ;;  %562 = vmatpush3.bf16.msra.mxu1 %v578_v0  ;;  %s643_s24 = scalar_lea.vmem %s675_s0, %s461_s21  ;;  %v584_v8 = vld [vmem:[%s676_s1 + $0x8] sm:$0xff]   ;;  %v585_v9 = vld [vmem:[%s676_s1] sm:$0xff]   ;;  %s172_s13 = scalar_lea.vmem %s678_s3, %s461_s21 }
   0xe   : > { %532 = vmatprep.subr.bf16.mxu0 %v579_v1  ;;  %555 = vmatprep.subr.bf16.mxu1 %v579_v1  ;;  %v586_v4 = vld [vmem:[%s643_s24] sm:$0xff]   ;;  %v587_v5 = vld [vmem:[%s643_s24 + $0x10] sm:$0xff]   ;;  %v588_v10 = vld [vmem:[%s643_s24 + $0x8] sm:$0xff]  }
   0xf   : > { %546 = vmatprep.mubr.bf16.mxu0 %v586_v4  ;;  %550 = vmatprep.mubr.bf16.mxu1 %v587_v5  ;;  %v589_v11 = vld [vmem:[%s643_s24 + $0x18] sm:$0xff]   ;;  %v464_v12 = vld [vmem:[%s677_s2] ss:$0 sm:$0xff] }
  0x11   : > { %533 = vmatpush3.bf16.msra.mxu0 %v579_v1  ;;  %563 = vmatpush3.bf16.msra.mxu1 %v579_v1 }
  0x12   : > { %534 = vmatprep.subr.bf16.mxu0 %v580_v2  ;;  %556 = vmatprep.subr.bf16.mxu1 %v580_v2 }
  0x15   : > { %535 = vmatpush3.bf16.msra.mxu0 %v580_v2  ;;  %564 = vmatpush3.bf16.msra.mxu1 %v580_v2 }
  0x16   : > { %536 = vmatprep.subr.bf16.mxu0 %v581_v3  ;;  %557 = vmatprep.subr.bf16.mxu1 %v581_v3 }
  0x19   : > { %537 = vmatpush3.bf16.msra.mxu0 %v581_v3  ;;  %565 = vmatpush3.bf16.msra.mxu1 %v581_v3 }
  0x1a   : > { %538 = vmatprep.subr.bf16.mxu0 %v582_v6  ;;  %558 = vmatprep.subr.bf16.mxu1 %v582_v6 }
  0x1d   : > { %539 = vmatpush3.bf16.msra.mxu0 %v582_v6  ;;  %566 = vmatpush3.bf16.msra.mxu1 %v582_v6 }
  0x1e   : > { %540 = vmatprep.subr.bf16.mxu0 %v583_v7  ;;  %559 = vmatprep.subr.bf16.mxu1 %v583_v7 }
  0x21   : > { %541 = vmatpush3.bf16.msra.mxu0 %v583_v7  ;;  %567 = vmatpush3.bf16.msra.mxu1 %v583_v7 }
  0x22   : > { %542 = vmatprep.subr.bf16.mxu0 %v584_v8  ;;  %560 = vmatprep.subr.bf16.mxu1 %v584_v8 }
  0x25   : > { %543 = vmatpush3.bf16.msra.mxu0 %v584_v8  ;;  %568 = vmatpush3.bf16.msra.mxu1 %v584_v8 }
  0x26   : > { %544 = vmatprep.subr.bf16.mxu0 %v585_v9  ;;  %561 = vmatprep.subr.bf16.mxu1 %v585_v9 }
  0x29   : > { %545 = vmatpush3.bf16.msra.mxu0 %v585_v9  ;;  %569 = vmatpush3.bf16.msra.mxu1 %v585_v9 }
  0x2c   : > { %547 = vmatmul.mubr.bf16.vlgmr.msra.gmra.mxu0 %v588_v10  ;;  %551 = vmatmul.mubr.bf16.vlgmr.msra.gmra.mxu1 %v589_v11 }
  0xec   : > { %v548_v13 = vpop.f32.mrf.mxu0  ;;  %v552_v14 = vpop.f32.mrf.mxu1 }
  0xed   : > { %v321_v15 = vadd.f32 %v548_v13, %v464_v12  ;;  %v337_v16 = vadd.f32 %v552_v14, %v464_v12 }
  0xee   : > { %v312_v17 = vpop.f32.mrf.mxu0  ;;  %v328_v18 = vpop.f32.mrf.mxu1 }
  0xef   : > { %v313_v19 = vadd.f32 %v464_v12, %v312_v17  ;;  %v329_v20 = vadd.f32 %v464_v12, %v328_v18  ;;  %v345_v23 = vmul.f32 0.1, %v321_v15  ;;  %v349_v24 = vmul.f32 0.1, %v337_v16 }
  0xf0   : > { %v549_v21 = vpop.f32.mrf.mxu0  ;;  %v553_v22 = vpop.f32.mrf.mxu1 }
  0xf1   : > { %v324_v25 = vadd.f32 %v549_v21, %v464_v12  ;;  %v340_v26 = vadd.f32 %v553_v22, %v464_v12  ;;  %v343_v29 = vmul.f32 0.1, %v313_v19  ;;  %v347_v30 = vmul.f32 0.1, %v329_v20 }
  0xf2   : > { %v315_v27 = vpop.f32.mrf.mxu0  ;;  %v331_v28 = vpop.f32.mrf.mxu1  ;;  %v353_v37 = vmax.f32 %v321_v15, %v345_v23  ;;  %v357_v38 = vmax.f32 %v337_v16, %v349_v24 }
  0xf3   : > { %v316_v31 = vadd.f32 %v464_v12, %v315_v27  ;;  %v332_v32 = vadd.f32 %v464_v12, %v331_v28  ;;  %v346_v33 = vmul.f32 0.1, %v324_v25  ;;  %v350_v34 = vmul.f32 0.1, %v340_v26 }
  0xf4   : > { %v351_v41 = vmax.f32 %v313_v19, %v343_v29  ;;  %v355_v42 = vmax.f32 %v329_v20, %v347_v30 }
  0xf5   : > { %v344_v35 = vmul.f32 0.1, %v316_v31  ;;  %v348_v36 = vmul.f32 0.1, %v332_v32  ;;  %v354_v39 = vmax.f32 %v324_v25, %v346_v33  ;;  %v358_v40 = vmax.f32 %v340_v26, %v350_v34 }
  0xf7   : > { %v352_v43 = vmax.f32 %v316_v31, %v344_v35  ;;  %v356_v44 = vmax.f32 %v332_v32, %v348_v36  ;;  %v503_v45 = vpack.c.bf16 %v354_v39, %v353_v37  ;;  %v513_v46 = vpack.c.bf16 %v358_v40, %v357_v38 }
  0xf9   : > { %v498_v47 = vpack.c.bf16 %v352_v43, %v351_v41  ;;  %v508_v48 = vpack.c.bf16 %v356_v44, %v355_v42  ;;  %515 = vst [vmem:[%s172_s13 + $0x8] sm:$0xff] %v503_v45   ;;  %517 = vst [vmem:[%s172_s13 + $0x18] sm:$0xff] %v513_v46  }
  0xfb   : > { %499 = vst [vmem:[%s172_s13] sm:$0xff] %v498_v47   ;;  %516 = vst [vmem:[%s172_s13 + $0x10] sm:$0xff] %v508_v48  }
  0xfc PF: > { %s13_s12 = sadd.s32 1, %s596_s12  }
  0xfd   : > { %p10_p4 = scmp.ge.s32.totalorder %s13_s12, 4  }
  0xff   :  { %12 = sbr.rel (!%p10_p4) target bundleno = 1 (0x1), region = 62 }

// kernel: _lambda_.13
= control target key start
LH: loop header
LB: loop body
LE: loop exit
PB: predicated region body
PF: predicated region fallthrough
CT: control target
= control target key end

     0   :  { %s729_s15 = smov 0   ;;  %s787_s0 = inlined_call_operand.vmem [shape: bf16[128,128], index: 0, kind: input, shape index: {}]   ;;  %s788_s1 = inlined_call_operand.vmem [shape: bf16[128,128], index: 1, kind: input, shape index: {}]   ;;  %s789_s2 = inlined_call_operand.vmem [shape: f32[1,128], index: 2, kind: input, shape index: {}]   ;;  %s790_s3 = inlined_call_operand.vmem [shape: bf16[128,128], index: 3, kind: input, shape index: {}]   ;;  %s791_s4 = inlined_call_operand.vmem [shape: bf16[128,128], index: 4, kind: output, shape index: {}]  }
   0x1 LB: > { %s540_s16 = sadd.s32 4294967295, %s702_s15   ;;  %p544_p0 = scmp.ge.s32.totalorder %s702_s15, 1  ;;  %s702_s15 = sphi %s729_s15, %s14_s15  }
   0x2   : > { %p174_p1 = scmp.lt.s32.totalorder %s702_s15, 3 }
   0x4   : > { %p175_p2 = pnand %p544_p0, %p174_p1 }
   0x5   : > { %s545_s19 = sshll.u32 (!%p175_p2), %s540_s16, 3 }
   0x6   : > { %178 = sbr.rel (%p175_p2) target bundleno = 254 (0xfe), region = 36  ;;  %p206_p3 = scmp.lt.s32.totalorder (!%p175_p2), %s545_s19, 15 }
   0xb   : > { %v684_v0 = vld [vmem:[%s788_s1 + $0x38] sm:$0xff]   ;;  %v685_v1 = vld [vmem:[%s788_s1 + $0x30] sm:$0xff]   ;;  %s793_s19 = smov (!%p206_p3, %s545_s19), 15  ;;  %v686_v2 = vld [vmem:[%s788_s1 + $0x28] sm:$0xff]  }
   0xc   : > { %636 = vmatprep.subr.bf16.mxu0 %v684_v0  ;;  %660 = vmatprep.subr.bf16.mxu1 %v684_v0  ;;  %s746_s24 = sshll.u32 %s793_s19, 2  ;;  %v687_v3 = vld [vmem:[%s788_s1 + $0x20] sm:$0xff]   ;;  %v688_v6 = vld [vmem:[%s788_s1 + $0x18] sm:$0xff]   ;;  %v689_v7 = vld [vmem:[%s788_s1 + $0x10] sm:$0xff]  }
   0xd   : > { %637 = vmatpush3.bf16.msra.mxu0 %v684_v0  ;;  %668 = vmatpush3.bf16.msra.mxu1 %v684_v0  ;;  %s752_s27 = scalar_lea.vmem %s787_s0, %s746_s24  ;;  %v690_v8 = vld [vmem:[%s788_s1 + $0x8] sm:$0xff]   ;;  %v691_v9 = vld [vmem:[%s788_s1] sm:$0xff]   ;;  %s215_s17 = scalar_lea.vmem %s790_s3, %s746_s24 }
   0xe   : > { %638 = vmatprep.subr.bf16.mxu0 %v685_v1  ;;  %661 = vmatprep.subr.bf16.mxu1 %v685_v1  ;;  %v692_v4 = vld [vmem:[%s752_s27] sm:$0xff]   ;;  %v693_v5 = vld [vmem:[%s752_s27 + $0x10] sm:$0xff]   ;;  %v694_v10 = vld [vmem:[%s752_s27 + $0x8] sm:$0xff]   ;;  %s221_s20 = scalar_lea.vmem %s791_s4, %s746_s24 }
   0xf   : > { %652 = vmatprep.mubr.bf16.mxu0 %v692_v4  ;;  %656 = vmatprep.mubr.bf16.mxu1 %v693_v5  ;;  %v695_v11 = vld [vmem:[%s752_s27 + $0x18] sm:$0xff]   ;;  %v551_v12 = vld [vmem:[%s789_s2] ss:$0 sm:$0xff]  ;;  %v618_v17 = vld [vmem:[%s215_s17 + $0x8] sm:$0xff]  }
  0x10   : > { %v620_v18 = vld [vmem:[%s215_s17 + $0x18] sm:$0xff]   ;;  %v583_v24 = vld [vmem:[%s215_s17] sm:$0xff]   ;;  %v619_v26 = vld [vmem:[%s215_s17 + $0x10] sm:$0xff]   ;;  %v588_v29 = vunpack.c.l.bf16 %v618_v17  ;;  %v589_v41 = vunpack.c.h.bf16 %v618_v17 }
  0x11   : > { %639 = vmatpush3.bf16.msra.mxu0 %v685_v1  ;;  %669 = vmatpush3.bf16.msra.mxu1 %v685_v1  ;;  %v596_v30 = vunpack.c.l.bf16 %v620_v18  ;;  %v584_v33 = vunpack.c.l.bf16 %v583_v24  ;;  %v592_v34 = vunpack.c.l.bf16 %v619_v26  ;;  %v597_v42 = vunpack.c.h.bf16 %v620_v18 }
  0x12   : > { %640 = vmatprep.subr.bf16.mxu0 %v686_v2  ;;  %662 = vmatprep.subr.bf16.mxu1 %v686_v2  ;;  %v585_v49 = vunpack.c.h.bf16 %v583_v24  ;;  %v593_v50 = vunpack.c.h.bf16 %v619_v26 }
  0x15   : > { %641 = vmatpush3.bf16.msra.mxu0 %v686_v2  ;;  %670 = vmatpush3.bf16.msra.mxu1 %v686_v2 }
  0x16   : > { %642 = vmatprep.subr.bf16.mxu0 %v687_v3  ;;  %663 = vmatprep.subr.bf16.mxu1 %v687_v3 }
  0x19   : > { %643 = vmatpush3.bf16.msra.mxu0 %v687_v3  ;;  %671 = vmatpush3.bf16.msra.mxu1 %v687_v3 }
  0x1a   : > { %644 = vmatprep.subr.bf16.mxu0 %v688_v6  ;;  %664 = vmatprep.subr.bf16.mxu1 %v688_v6 }
  0x1d   : > { %645 = vmatpush3.bf16.msra.mxu0 %v688_v6  ;;  %672 = vmatpush3.bf16.msra.mxu1 %v688_v6 }
  0x1e   : > { %646 = vmatprep.subr.bf16.mxu0 %v689_v7  ;;  %665 = vmatprep.subr.bf16.mxu1 %v689_v7 }
  0x21   : > { %647 = vmatpush3.bf16.msra.mxu0 %v689_v7  ;;  %673 = vmatpush3.bf16.msra.mxu1 %v689_v7 }
  0x22   : > { %648 = vmatprep.subr.bf16.mxu0 %v690_v8  ;;  %666 = vmatprep.subr.bf16.mxu1 %v690_v8 }
  0x25   : > { %649 = vmatpush3.bf16.msra.mxu0 %v690_v8  ;;  %674 = vmatpush3.bf16.msra.mxu1 %v690_v8 }
  0x26   : > { %650 = vmatprep.subr.bf16.mxu0 %v691_v9  ;;  %667 = vmatprep.subr.bf16.mxu1 %v691_v9 }
  0x29   : > { %651 = vmatpush3.bf16.msra.mxu0 %v691_v9  ;;  %675 = vmatpush3.bf16.msra.mxu1 %v691_v9 }
  0x2c   : > { %653 = vmatmul.mubr.bf16.vlgmr.msra.gmra.mxu0 %v694_v10  ;;  %657 = vmatmul.mubr.bf16.vlgmr.msra.gmra.mxu1 %v695_v11 }
  0xec   : > { %v654_v13 = vpop.f32.mrf.mxu0  ;;  %v658_v14 = vpop.f32.mrf.mxu1 }
  0xed   : > { %v370_v15 = vadd.f32 %v654_v13, %v551_v12  ;;  %v386_v16 = vadd.f32 %v658_v14, %v551_v12 }
  0xee   : > { %v361_v19 = vpop.f32.mrf.mxu0  ;;  %v377_v20 = vpop.f32.mrf.mxu1 }
  0xef   : > { %v394_v21 = vmul.f32 0.1, %v370_v15  ;;  %v398_v22 = vmul.f32 0.1, %v386_v16  ;;  %v362_v23 = vadd.f32 %v551_v12, %v361_v19  ;;  %v378_v25 = vadd.f32 %v551_v12, %v377_v20 }
  0xf0   : > { %v655_v27 = vpop.f32.mrf.mxu0  ;;  %v659_v28 = vpop.f32.mrf.mxu1 }
  0xf1   : > { %v392_v31 = vmul.f32 0.1, %v362_v23  ;;  %v396_v32 = vmul.f32 0.1, %v378_v25  ;;  %v373_v35 = vadd.f32 %v655_v27, %v551_v12  ;;  %v389_v36 = vadd.f32 %v659_v28, %v551_v12 }
  0xf2   : > { %v364_v37 = vpop.f32.mrf.mxu0  ;;  %v380_v38 = vpop.f32.mrf.mxu1  ;;  %v402_v39 = vmax.f32 %v370_v15, %v394_v21  ;;  %v406_v40 = vmax.f32 %v386_v16, %v398_v22 }
  0xf3   : > { %v395_v43 = vmul.f32 0.1, %v373_v35  ;;  %v399_v44 = vmul.f32 0.1, %v389_v36  ;;  %v365_v45 = vadd.f32 %v551_v12, %v364_v37  ;;  %v381_v46 = vadd.f32 %v551_v12, %v380_v38 }
  0xf4   : > { %v400_v47 = vmax.f32 %v362_v23, %v392_v31  ;;  %v404_v48 = vmax.f32 %v378_v25, %v396_v32  ;;  %v426_v55 = vadd.f32 %v588_v29, %v402_v39  ;;  %v430_v56 = vadd.f32 %v596_v30, %v406_v40 }
  0xf5   : > { %v403_v51 = vmax.f32 %v373_v35, %v395_v43  ;;  %v407_v52 = vmax.f32 %v389_v36, %v399_v44  ;;  %v393_v53 = vmul.f32 0.1, %v365_v45  ;;  %v397_v54 = vmul.f32 0.1, %v381_v46 }
  0xf6   : > { %v424_v61 = vadd.f32 %v584_v33, %v400_v47  ;;  %v428_v62 = vadd.f32 %v592_v34, %v404_v48 }
  0xf7   : > { %v427_v57 = vadd.f32 %v589_v41, %v403_v51  ;;  %v431_v58 = vadd.f32 %v597_v42, %v407_v52  ;;  %v401_v59 = vmax.f32 %v365_v45, %v393_v53  ;;  %v405_v60 = vmax.f32 %v381_v46, %v397_v54 }
  0xf9   : > { %v606_v63 = vpack.c.bf16 %v427_v57, %v426_v55  ;;  %v616_v0 = vpack.c.bf16 %v431_v58, %v430_v56  ;;  %v425_v1 = vadd.f32 %v585_v49, %v401_v59  ;;  %v429_v2 = vadd.f32 %v593_v50, %v405_v60 }
  0xfb   : > { %621 = vst [vmem:[%s221_s20 + $0x8] sm:$0xff] %v606_v63   ;;  %623 = vst [vmem:[%s221_s20 + $0x18] sm:$0xff] %v616_v0   ;;  %v601_v3 = vpack.c.bf16 %v425_v1, %v424_v61  ;;  %v611_v4 = vpack.c.bf16 %v429_v2, %v428_v62 }
  0xfd   : > { %602 = vst [vmem:[%s221_s20] sm:$0xff] %v601_v3   ;;  %622 = vst [vmem:[%s221_s20 + $0x10] sm:$0xff] %v611_v4  }
  0xfe PF: > { %s14_s15 = sadd.s32 1, %s702_s15  }
  0xff   : > { %p11_p4 = scmp.ge.s32.totalorder %s14_s15, 4  }
 0x101   :  { %13 = sbr.rel (!%p11_p4) target bundleno = 1 (0x1), region = 69 }

// kernel: _lambda_.14
= control target key start
LH: loop header
LB: loop body
LE: loop exit
PB: predicated region body
PF: predicated region fallthrough
CT: control target
= control target key end

     0   :  { %s450_s1 = inlined_call_operand.vmem [shape: bf16[256,128], index: 1, kind: input, shape index: {}]   ;;  %s451_s0 = inlined_call_operand.vmem [shape: bf16[32,256], index: 0, kind: input, shape index: {}]   ;;  %s452_s2 = inlined_call_operand.vmem [shape: f32[1,128], index: 2, kind: input, shape index: {}]   ;;  %s453_s3 = inlined_call_operand.vmem [shape: bf16[32,128], index: 3, kind: output, shape index: {}]  }
   0x1   :  { %v339_v0 = vld [vmem:[%s450_s1 + $0x78] sm:$0xff]   ;;  %v341_v2 = vld [vmem:[%s450_s1 + $0x70] sm:$0xff]   ;;  %v343_v4 = vld [vmem:[%s450_s1 + $0x68] sm:$0xff]  }
   0x2   :  { %v340_v1 = vld [vmem:[%s450_s1 + $0x38] sm:$0xff]   ;;  %295 = vmatprep.subr.bf16.mxu0 %v339_v0  ;;  %323 = vmatprep.subr.bf16.mxu1 %v339_v0  ;;  %v342_v3 = vld [vmem:[%s450_s1 + $0x30] sm:$0xff]   ;;  %v344_v5 = vld [vmem:[%s450_s1 + $0x28] sm:$0xff]  }
   0x3   :  { %296 = vmatpush3.bf16.msra.mxu0 %v340_v1  ;;  %331 = vmatpush3.bf16.msra.mxu1 %v340_v1  ;;  %v345_v6 = vld [vmem:[%s450_s1 + $0x60] sm:$0xff]   ;;  %v347_v8 = vld [vmem:[%s450_s1 + $0x58] sm:$0xff]   ;;  %v349_v10 = vld [vmem:[%s450_s1 + $0x50] sm:$0xff]  }
   0x4   :  { %297 = vmatprep.subr.bf16.mxu0 %v341_v2  ;;  %324 = vmatprep.subr.bf16.mxu1 %v341_v2  ;;  %v346_v7 = vld [vmem:[%s450_s1 + $0x20] sm:$0xff]   ;;  %v348_v9 = vld [vmem:[%s450_s1 + $0x18] sm:$0xff]   ;;  %v350_v13 = vld [vmem:[%s450_s1 + $0x10] sm:$0xff]  }
   0x5   :  { %v357_v11 = vld [vmem:[%s451_s0 + $0x4] ss:$8 sps:$4 sm:$0xff]   ;;  %v360_v12 = vld [vmem:[%s451_s0 + $0x14] ss:$8 sps:$4 sm:$0xff]   ;;  %v355_v18 = vld [vmem:[%s451_s0] ss:$8 sps:$4 sm:$0xff]  }
   0x6   :  { %v351_v14 = vld [vmem:[%s450_s1 + $0x48] sm:$0xff]   ;;  %206 = vmatprep.mubr.bf16.mxu0 %v357_v11  ;;  %214 = vmatprep.mubr.bf16.mxu1 %v360_v12  ;;  %v353_v16 = vld [vmem:[%s450_s1 + $0x40] sm:$0xff]   ;;  %v358_v19 = vld [vmem:[%s451_s0 + $0x10] ss:$8 sps:$4 sm:$0xff]  }
   0x7   :  { %298 = vmatpush3.bf16.msra.mxu0 %v342_v3  ;;  %332 = vmatpush3.bf16.msra.mxu1 %v342_v3  ;;  %v352_v15 = vld [vmem:[%s450_s1 + $0x8] sm:$0xff]   ;;  %v354_v17 = vld [vmem:[%s450_s1] sm:$0xff]  }
   0x8   :  { %299 = vmatprep.subr.bf16.mxu0 %v343_v4  ;;  %325 = vmatprep.subr.bf16.mxu1 %v343_v4  ;;  %v255_v22 = vld [vmem:[%s452_s2] ss:$0 sm:$0xff] }
   0xb   :  { %300 = vmatpush3.bf16.msra.mxu0 %v344_v5  ;;  %333 = vmatpush3.bf16.msra.mxu1 %v344_v5 }
   0xc   :  { %301 = vmatprep.subr.bf16.mxu0 %v345_v6  ;;  %326 = vmatprep.subr.bf16.mxu1 %v345_v6 }
   0xf   :  { %302 = vmatpush3.bf16.msra.mxu0 %v346_v7  ;;  %334 = vmatpush3.bf16.msra.mxu1 %v346_v7 }
  0x10   :  { %303 = vmatprep.subr.bf16.mxu0 %v347_v8  ;;  %327 = vmatprep.subr.bf16.mxu1 %v347_v8 }
  0x13   :  { %304 = vmatpush3.bf16.msra.mxu0 %v348_v9  ;;  %335 = vmatpush3.bf16.msra.mxu1 %v348_v9 }
  0x14   :  { %305 = vmatprep.subr.bf16.mxu0 %v349_v10  ;;  %328 = vmatprep.subr.bf16.mxu1 %v349_v10 }
  0x17   :  { %306 = vmatpush3.bf16.msra.mxu0 %v350_v13  ;;  %336 = vmatpush3.bf16.msra.mxu1 %v350_v13 }
  0x18   :  { %307 = vmatprep.subr.bf16.mxu0 %v351_v14  ;;  %329 = vmatprep.subr.bf16.mxu1 %v351_v14 }
  0x1b   :  { %308 = vmatpush3.bf16.msra.mxu0 %v352_v15  ;;  %337 = vmatpush3.bf16.msra.mxu1 %v352_v15 }
  0x1c   :  { %309 = vmatprep.subr.bf16.mxu0 %v353_v16  ;;  %330 = vmatprep.subr.bf16.mxu1 %v353_v16 }
  0x1f   :  { %310 = vmatpush3.bf16.msra.mxu0 %v354_v17  ;;  %338 = vmatpush3.bf16.msra.mxu1 %v354_v17 }
  0x22   :  { %207 = vmatmul.mubr.bf16.vlgmr.msra.gmra.mxu0 %v355_v18  ;;  %215 = vmatmul.mubr.bf16.vlgmr.msra.gmra.mxu1 %v358_v19 }
  0xe2   :  { %v311_v20 = vpop.f32.mrf.mxu0  ;;  %v317_v21 = vpop.f32.mrf.mxu1 }
  0xe4   :  { %v312_v23 = vpop.f32.mrf.mxu0  ;;  %v318_v24 = vpop.f32.mrf.mxu1 }
  0xe5   :  { %v313_v25 = vadd.f32 %v312_v23, %v311_v20  ;;  %v319_v26 = vadd.f32 %v318_v24, %v317_v21 }
  0xe6   :  { %v314_v27 = vpop.f32.mrf.mxu0  ;;  %v320_v28 = vpop.f32.mrf.mxu1 }
  0xe7   :  { %v209_v29 = vadd.f32 %v313_v25, %v255_v22  ;;  %v217_v30 = vadd.f32 %v319_v26, %v255_v22 }
  0xe8   :  { %v315_v31 = vpop.f32.mrf.mxu0  ;;  %v321_v32 = vpop.f32.mrf.mxu1 }
  0xe9   :  { %v316_v33 = vadd.f32 %v315_v31, %v314_v27  ;;  %v322_v34 = vadd.f32 %v321_v32, %v320_v28  ;;  %v223_v35 = vmul.f32 0.1, %v209_v29  ;;  %v225_v36 = vmul.f32 0.1, %v217_v30 }
  0xeb   :  { %v212_v37 = vadd.f32 %v316_v33, %v255_v22  ;;  %v220_v38 = vadd.f32 %v322_v34, %v255_v22  ;;  %v227_v41 = vmax.f32 %v209_v29, %v223_v35  ;;  %v229_v42 = vmax.f32 %v217_v30, %v225_v36 }
  0xed   :  { %v224_v39 = vmul.f32 0.1, %v212_v37  ;;  %v226_v40 = vmul.f32 0.1, %v220_v38 }
  0xef   :  { %v228_v43 = vmax.f32 %v212_v37, %v224_v39  ;;  %v230_v44 = vmax.f32 %v220_v38, %v226_v40 }
  0xf1   :  { %v287_v45 = vpack.c.bf16 %v228_v43, %v227_v41  ;;  %v292_v46 = vpack.c.bf16 %v230_v44, %v229_v42 }
  0xf3   :  { %288 = vst [vmem:[%s453_s3] sm:$0xff] %v287_v45   ;;  %294 = vst [vmem:[%s453_s3 + $0x8] sm:$0xff] %v292_v46  }

// kernel: _lambda_.17
= control target key start
LH: loop header
LB: loop body
LE: loop exit
PB: predicated region body
PF: predicated region fallthrough
CT: control target
= control target key end

     0   :  { %s312_s1 = inlined_call_operand.vmem [shape: bf16[128,128], index: 1, kind: input, shape index: {}]   ;;  %s313_s0 = inlined_call_operand.vmem [shape: bf16[32,128], index: 0, kind: input, shape index: {}]   ;;  %s314_s2 = inlined_call_operand.vmem [shape: f32[1,128], index: 2, kind: input, shape index: {}]   ;;  %s315_s3 = inlined_call_operand.vmem [shape: bf16[32,128], index: 3, kind: output, shape index: {}]  }
   0x1   :  { %v243_v0 = vld [vmem:[%s312_s1 + $0x38] sm:$0xff]   ;;  %v244_v1 = vld [vmem:[%s312_s1 + $0x30] sm:$0xff]   ;;  %v245_v2 = vld [vmem:[%s312_s1 + $0x28] sm:$0xff]  }
   0x2   :  { %223 = vmatprep.subr.bf16.mxu0 %v243_v0  ;;  %v246_v3 = vld [vmem:[%s312_s1 + $0x20] sm:$0xff]   ;;  %v247_v5 = vld [vmem:[%s312_s1 + $0x18] sm:$0xff]   ;;  %v248_v6 = vld [vmem:[%s312_s1 + $0x10] sm:$0xff]  }
   0x3   :  { %224 = vmatpush3.bf16.msra.mxu0 %v243_v0  ;;  %v251_v4 = vld [vmem:[%s313_s0] sm:$0xff]   ;;  %v249_v7 = vld [vmem:[%s312_s1 + $0x8] sm:$0xff]  }
   0x4   :  { %225 = vmatprep.subr.bf16.mxu0 %v244_v1  ;;  %239 = vmatprep.mubr.bf16.mxu0 %v251_v4  ;;  %v250_v8 = vld [vmem:[%s312_s1] sm:$0xff]   ;;  %v252_v9 = vld [vmem:[%s313_s0 + $0x8] sm:$0xff]  }
   0x5   :  { %v183_v10 = vld [vmem:[%s314_s2] ss:$0 sm:$0xff] }
   0x7   :  { %226 = vmatpush3.bf16.msra.mxu0 %v244_v1 }
   0x8   :  { %227 = vmatprep.subr.bf16.mxu0 %v245_v2 }
   0xb   :  { %228 = vmatpush3.bf16.msra.mxu0 %v245_v2 }
   0xc   :  { %229 = vmatprep.subr.bf16.mxu0 %v246_v3 }
   0xf   :  { %230 = vmatpush3.bf16.msra.mxu0 %v246_v3 }
  0x10   :  { %231 = vmatprep.subr.bf16.mxu0 %v247_v5 }
  0x13   :  { %232 = vmatpush3.bf16.msra.mxu0 %v247_v5 }
  0x14   :  { %233 = vmatprep.subr.bf16.mxu0 %v248_v6 }
  0x17   :  { %234 = vmatpush3.bf16.msra.mxu0 %v248_v6 }
  0x18   :  { %235 = vmatprep.subr.bf16.mxu0 %v249_v7 }
  0x1b   :  { %236 = vmatpush3.bf16.msra.mxu0 %v249_v7 }
  0x1c   :  { %237 = vmatprep.subr.bf16.mxu0 %v250_v8 }
  0x1f   :  { %238 = vmatpush3.bf16.msra.mxu0 %v250_v8 }
  0x22   :  { %240 = vmatmul.mubr.bf16.vlgmr.msra.gmra.mxu0 %v252_v9 }
  0xe2   :  { %v241_v11 = vpop.f32.mrf.mxu0 }
  0xe3   :  { %v145_v12 = vadd.f32 %v241_v11, %v183_v10 }
  0xe4   :  { %v136_v13 = vpop.f32.mrf.mxu0 }
  0xe5   :  { %v137_v14 = vadd.f32 %v183_v10, %v136_v13  ;;  %v153_v16 = vmul.f32 0.1, %v145_v12 }
  0xe6   :  { %v242_v15 = vpop.f32.mrf.mxu0 }
  0xe7   :  { %v148_v17 = vadd.f32 %v242_v15, %v183_v10  ;;  %v151_v19 = vmul.f32 0.1, %v137_v14  ;;  %v157_v22 = vmax.f32 %v145_v12, %v153_v16 }
  0xe8   :  { %v139_v18 = vpop.f32.mrf.mxu0 }
  0xe9   :  { %v154_v20 = vmul.f32 0.1, %v148_v17  ;;  %v140_v21 = vadd.f32 %v183_v10, %v139_v18  ;;  %v155_v25 = vmax.f32 %v137_v14, %v151_v19 }
  0xeb   :  { %v158_v23 = vmax.f32 %v148_v17, %v154_v20  ;;  %v152_v24 = vmul.f32 0.1, %v140_v21 }
  0xed   :  { %v210_v26 = vpack.c.bf16 %v158_v23, %v157_v22  ;;  %v156_v27 = vmax.f32 %v140_v21, %v152_v24 }
  0xef   :  { %212 = vst [vmem:[%s315_s3 + $0x8] sm:$0xff] %v210_v26   ;;  %v205_v28 = vpack.c.bf16 %v156_v27, %v155_v25 }
  0xf1   :  { %206 = vst [vmem:[%s315_s3] sm:$0xff] %v205_v28  }

// kernel: _lambda_.15
= control target key start
LH: loop header
LB: loop body
LE: loop exit
PB: predicated region body
PF: predicated region fallthrough
CT: control target
= control target key end

     0   :  { %s304_s1 = inlined_call_operand.vmem [shape: bf16[128,128], index: 1, kind: input, shape index: {}]   ;;  %s305_s0 = inlined_call_operand.vmem [shape: bf16[32,128], index: 0, kind: input, shape index: {}]   ;;  %s306_s2 = inlined_call_operand.vmem [shape: f32[1,128], index: 2, kind: input, shape index: {}]   ;;  %s307_s3 = inlined_call_operand.vmem [shape: bf16[32,128], index: 3, kind: output, shape index: {}]  }
   0x1   :  { %v235_v0 = vld [vmem:[%s304_s1 + $0x38] sm:$0xff]   ;;  %v236_v1 = vld [vmem:[%s304_s1 + $0x30] sm:$0xff]   ;;  %v237_v2 = vld [vmem:[%s304_s1 + $0x28] sm:$0xff]  }
   0x2   :  { %215 = vmatprep.subr.bf16.mxu0 %v235_v0  ;;  %v238_v3 = vld [vmem:[%s304_s1 + $0x20] sm:$0xff]   ;;  %v239_v5 = vld [vmem:[%s304_s1 + $0x18] sm:$0xff]   ;;  %v240_v6 = vld [vmem:[%s304_s1 + $0x10] sm:$0xff]  }
   0x3   :  { %216 = vmatpush3.bf16.msra.mxu0 %v235_v0  ;;  %v243_v4 = vld [vmem:[%s305_s0] sm:$0xff]   ;;  %v241_v7 = vld [vmem:[%s304_s1 + $0x8] sm:$0xff]  }
   0x4   :  { %217 = vmatprep.subr.bf16.mxu0 %v236_v1  ;;  %231 = vmatprep.mubr.bf16.mxu0 %v243_v4  ;;  %v242_v8 = vld [vmem:[%s304_s1] sm:$0xff]   ;;  %v244_v9 = vld [vmem:[%s305_s0 + $0x8] sm:$0xff]  }
   0x5   :  { %v175_v11 = vld [vmem:[%s306_s2] ss:$0 sm:$0xff] }
   0x7   :  { %218 = vmatpush3.bf16.msra.mxu0 %v236_v1 }
   0x8   :  { %219 = vmatprep.subr.bf16.mxu0 %v237_v2 }
   0xb   :  { %220 = vmatpush3.bf16.msra.mxu0 %v237_v2 }
   0xc   :  { %221 = vmatprep.subr.bf16.mxu0 %v238_v3 }
   0xf   :  { %222 = vmatpush3.bf16.msra.mxu0 %v238_v3 }
  0x10   :  { %223 = vmatprep.subr.bf16.mxu0 %v239_v5 }
  0x13   :  { %224 = vmatpush3.bf16.msra.mxu0 %v239_v5 }
  0x14   :  { %225 = vmatprep.subr.bf16.mxu0 %v240_v6 }
  0x17   :  { %226 = vmatpush3.bf16.msra.mxu0 %v240_v6 }
  0x18   :  { %227 = vmatprep.subr.bf16.mxu0 %v241_v7 }
  0x1b   :  { %228 = vmatpush3.bf16.msra.mxu0 %v241_v7 }
  0x1c   :  { %229 = vmatprep.subr.bf16.mxu0 %v242_v8 }
  0x1f   :  { %230 = vmatpush3.bf16.msra.mxu0 %v242_v8 }
  0x22   :  { %232 = vmatmul.mubr.bf16.vlgmr.msra.gmra.mxu0 %v244_v9 }
  0xe2   :  { %v233_v10 = vpop.f32.mrf.mxu0 }
  0xe3   :  { %v145_v14 = vadd.f32 %v233_v10, %v175_v11 }
  0xe4   :  { %v136_v12 = vpop.f32.mrf.mxu0 }
  0xe5   :  { %v137_v17 = vadd.f32 %v175_v11, %v136_v12 }
  0xe6   :  { %v234_v13 = vpop.f32.mrf.mxu0 }
  0xe7   :  { %v148_v15 = vadd.f32 %v234_v13, %v175_v11 }
  0xe8   :  { %v139_v16 = vpop.f32.mrf.mxu0 }
  0xe9   :  { %v202_v18 = vpack.c.bf16 %v148_v15, %v145_v14  ;;  %v140_v19 = vadd.f32 %v175_v11, %v139_v16 }
  0xeb   :  { %204 = vst [vmem:[%s307_s3 + $0x8] sm:$0xff] %v202_v18   ;;  %v197_v20 = vpack.c.bf16 %v140_v19, %v137_v17 }
  0xed   :  { %198 = vst [vmem:[%s307_s3] sm:$0xff] %v197_v20  }

// kernel: _lambda_.16
= control target key start
LH: loop header
LB: loop body
LE: loop exit
PB: predicated region body
PF: predicated region fallthrough
CT: control target
= control target key end

     0   :  { %s361_s9 = smov 0   ;;  %s389_s0 = inlined_call_operand.vmem [shape: bf16[2,4,4,128], index: 0, kind: input, shape index: {}]   ;;  %s390_s1 = inlined_call_operand.vmem [shape: f32[4,128], index: 1, kind: input, shape index: {}]   ;;  %s391_s2 = inlined_call_operand.vmem [shape: f32[2,4,4,128], index: 2, kind: output, shape index: {}]  }
   0x1 LB: > { %s291_s10 = sadd.s32 4294967295, %s343_s9   ;;  %p295_p0 = scmp.ge.s32.totalorder %s343_s9, 1  ;;  %s343_s9 = sphi %s361_s9, %s12_s9  }
   0x2   : > { %p112_p1 = scmp.lt.s32.totalorder %s343_s9, 3 }
   0x4   : > { %p113_p2 = pnand %p295_p0, %p112_p1 }
   0x5   : > { %p134_p3 = scmp.lt.s32.totalorder (!%p113_p2), %s291_s10, 1 }
   0x6   : > { %116 = sbr.rel (%p113_p2) target bundleno = 62 (0x3e), region = 28 }
   0xb   : > { %s393_s10 = smov (!%p134_p3, %s291_s10), 1  ;;  %v153_v19 = vlaneseq  ;;  %v152_v23 = vld [vmem:[%s390_s1] sm:$0xf]  ;;  %v345_v33 = vmov 0  }
   0xc   : > { %s302_s11 = sshll.u32 %s393_s10, 3  ;;  %vm192_vm0 = vcmp.gt.f32.partialorder %v152_v23, 0.5  ;;  %s303_s17 = sshll.u32 %s393_s10, 4 }
   0xd   : > { %s138_s14 = scalar_lea.vmem %s389_s0, %s302_s11  ;;  %v154_v26 = vshrl.u32 %v153_v19, 7  ;;  %v193_v34 = vsel %vm192_vm0, 1, %v345_v33  ;;  %s143_s20 = scalar_lea.vmem %s391_s2, %s303_s17 }
   0xe   : > { %v144_v0 = vld [vmem:[%s138_s14] sm:$0x3]  ;;  %v145_v1 = vld [vmem:[%s138_s14 + $0x2] sm:$0x3]  ;;  %v146_v2 = vld [vmem:[%s138_s14 + $0x4] sm:$0x3] }
   0xf   : > { %v147_v3 = vld [vmem:[%s138_s14 + $0x6] sm:$0x3]  ;;  %v148_v4 = vunpack.c.l.bf16 %v144_v0  ;;  %v149_v5 = vunpack.c.l.bf16 %v145_v1  ;;  %v150_v6 = vunpack.c.l.bf16 %v146_v2  ;;  %v196_v31 = vsub.s32 2, %v154_v26 }
  0x10   : > { %v151_v7 = vunpack.c.l.bf16 %v147_v3  ;;  %v205_v32 = vsub.s32 0, %v154_v26  ;;  %v214_v35 = vsub.s32 1, %v154_v26  ;;  %v155_v36 = vcvt.s32.f32 %v154_v26 }
  0x11   : > { %v160_v8 = vsub.f32 0.0, %v148_v4  ;;  %v161_v9 = vsub.f32 0.0, %v149_v5  ;;  %v162_v10 = vsub.f32 0.0, %v150_v6  ;;  %v184_v16 = vmul.f32 1.442695, %v148_v4 }
  0x12   : > { %v163_v11 = vsub.f32 0.0, %v151_v7  ;;  %v186_v17 = vmul.f32 1.442695, %v149_v5  ;;  %v188_v18 = vmul.f32 1.442695, %v150_v6  ;;  %v197_v37 = vrot.slane %v193_v34, %v196_v31 }
  0x13   : > { %v164_v12 = vmul.f32 1.442695, %v160_v8  ;;  %v166_v13 = vmul.f32 1.442695, %v161_v9  ;;  %v168_v14 = vmul.f32 1.442695, %v162_v10  ;;  %v206_v38 = vrot.slane %v152_v23, %v205_v32 }
  0x14   : > { %v170_v15 = vmul.f32 1.442695, %v163_v11  ;;  %v190_v20 = vmul.f32 1.442695, %v151_v7  ;;  %v215_v40 = vrot.slane %v152_v23, %v214_v35  ;;  %vm198_vm1 = vcmp.eq.s32.totalorder %v197_v37, 1 }
  0x15   : > { %313 = vpow2.f32 %v164_v12  ;;  %v207_v43 = vmul.f32 %v206_v38, %v155_v36  ;;  %v226_v44 = vsub.s32 3, %v154_v26 }
  0x16   : > { %315 = vpow2.f32 %v166_v13  ;;  %v216_v47 = vmul.f32 0.0, %v215_v40  ;;  %v218_v54 = vmul.f32 2.0, %v215_v40  ;;  %v219_v58 = vmul.f32 3.0, %v215_v40 }
  0x17   : > { %317 = vpow2.f32 %v168_v14  ;;  %v227_v52 = vrot.slane %v152_v23, %v226_v44 }
  0x18   : > { %319 = vpow2.f32 %v170_v15 }
  0x19   : > { %321 = vpow2.f32 %v184_v16 }
  0x1a   : > { %323 = vpow2.f32 %v186_v17 }
  0x1b   : > { %325 = vpow2.f32 %v188_v18 }
  0x1c   : > { %327 = vpow2.f32 %v190_v20 }
  0x22   : > { %v314_v21 = vpop.eup %313 }
  0x23   : > { %v316_v22 = vpop.eup %315  ;;  %v172_v24 = vadd.f32 1.0, %v314_v21 }
  0x24   : > { %v318_v25 = vpop.eup %317  ;;  %v173_v27 = vadd.f32 1.0, %v316_v22 }
  0x25   : > { %v320_v28 = vpop.eup %319  ;;  %v174_v29 = vadd.f32 1.0, %v318_v25  ;;  %329 = vrcp.f32 %v172_v24 }
  0x26   : > { %v175_v30 = vadd.f32 1.0, %v320_v28  ;;  %331 = vrcp.f32 %v173_v27  ;;  %v322_v39 = vpop.eup %321 }
  0x27   : > { %333 = vrcp.f32 %v174_v29  ;;  %v324_v41 = vpop.eup %323 }
  0x28   : > { %335 = vrcp.f32 %v175_v30  ;;  %v326_v42 = vpop.eup %325 }
  0x29   : > { %v328_v45 = vpop.eup %327 }
  0x32   : > { %v330_v46 = vpop.eup %329 }
  0x33   : > { %v332_v48 = vpop.eup %331  ;;  %v199_v49 = vsel %vm198_vm1, %v322_v39, %v330_v46 }
  0x34   : > { %v334_v50 = vpop.eup %333  ;;  %v208_v51 = vadd.f32 %v207_v43, %v199_v49  ;;  %v200_v53 = vsel %vm198_vm1, %v324_v41, %v332_v48 }
  0x35   : > { %v336_v55 = vpop.eup %335  ;;  %v209_v56 = vadd.f32 %v207_v43, %v200_v53  ;;  %v201_v57 = vsel %vm198_vm1, %v326_v42, %v334_v50 }
  0x36   : > { %v220_v59 = vadd.f32 %v216_v47, %v208_v51  ;;  %v210_v60 = vadd.f32 %v207_v43, %v201_v57  ;;  %v202_v61 = vsel %vm198_vm1, %v328_v45, %v336_v55 }
  0x37   : > { %v221_v62 = vadd.f32 %v215_v40, %v209_v56  ;;  %v211_v63 = vadd.f32 %v207_v43, %v202_v61 }
  0x38   : > { %v228_v0 = vmul.f32 %v227_v52, %v220_v59  ;;  %v222_v1 = vadd.f32 %v218_v54, %v210_v60 }
  0x39   : > { %v229_v2 = vmul.f32 %v227_v52, %v221_v62  ;;  %v223_v3 = vadd.f32 %v219_v58, %v211_v63 }
  0x3a   : > { %232 = vst [vmem:[%s143_s20] sm:$0xf] %v228_v0  ;;  %v230_v4 = vmul.f32 %v227_v52, %v222_v1 }
  0x3b   : > { %233 = vst [vmem:[%s143_s20 + $0x4] sm:$0xf] %v229_v2  ;;  %v231_v5 = vmul.f32 %v227_v52, %v223_v3 }
  0x3c   : > { %234 = vst [vmem:[%s143_s20 + $0x8] sm:$0xf] %v230_v4 }
  0x3d   : > { %235 = vst [vmem:[%s143_s20 + $0xc] sm:$0xf] %v231_v5 }
  0x3e PF: > { %s12_s9 = sadd.s32 1, %s343_s9  }
  0x3f   : > { %p9_p4 = scmp.ge.s32.totalorder %s12_s9, 4  }
  0x41   :  { %11 = sbr.rel (!%p9_p4) target bundleno = 1 (0x1), region = 58 }

// kernel: _lambda_.18
= control target key start
LH: loop header
LB: loop body
LE: loop exit
PB: predicated region body
PF: predicated region fallthrough
CT: control target
= control target key end

     0   :  { %s602_s12 = smov 0   ;;  %s659_s0 = inlined_call_operand.vmem [shape: bf16[128,128], index: 0, kind: input, shape index: {}]   ;;  %s660_s1 = inlined_call_operand.vmem [shape: bf16[128,128], index: 1, kind: input, shape index: {}]   ;;  %s661_s2 = inlined_call_operand.vmem [shape: f32[1,128], index: 2, kind: input, shape index: {}]   ;;  %s662_s3 = inlined_call_operand.vmem [shape: bf16[128,128], index: 3, kind: output, shape index: {}]  }
   0x1 LB: > { %s439_s13 = sadd.s32 4294967295, %s580_s12   ;;  %p443_p0 = scmp.ge.s32.totalorder %s580_s12, 1  ;;  %s580_s12 = sphi %s602_s12, %s13_s12  }
   0x2   : > { %p138_p1 = scmp.lt.s32.totalorder %s580_s12, 3 }
   0x4   : > { %p139_p2 = pnand %p443_p0, %p138_p1 }
   0x5   : > { %s444_s16 = sshll.u32 (!%p139_p2), %s439_s13, 3 }
   0x6   : > { %142 = sbr.rel (%p139_p2) target bundleno = 248 (0xf8), region = 32  ;;  %p163_p3 = scmp.lt.s32.totalorder (!%p139_p2), %s444_s16, 15 }
   0xb   : > { %v562_v0 = vld [vmem:[%s660_s1 + $0x38] sm:$0xff]   ;;  %v563_v1 = vld [vmem:[%s660_s1 + $0x30] sm:$0xff]   ;;  %s664_s16 = smov (!%p163_p3, %s444_s16), 15  ;;  %v564_v2 = vld [vmem:[%s660_s1 + $0x28] sm:$0xff]  }
   0xc   : > { %514 = vmatprep.subr.bf16.mxu0 %v562_v0  ;;  %538 = vmatprep.subr.bf16.mxu1 %v562_v0  ;;  %s445_s21 = sshll.u32 %s664_s16, 2  ;;  %v565_v3 = vld [vmem:[%s660_s1 + $0x20] sm:$0xff]   ;;  %v566_v6 = vld [vmem:[%s660_s1 + $0x18] sm:$0xff]   ;;  %v567_v7 = vld [vmem:[%s660_s1 + $0x10] sm:$0xff]  }
   0xd   : > { %515 = vmatpush3.bf16.msra.mxu0 %v562_v0  ;;  %546 = vmatpush3.bf16.msra.mxu1 %v562_v0  ;;  %s627_s24 = scalar_lea.vmem %s659_s0, %s445_s21  ;;  %v568_v8 = vld [vmem:[%s660_s1 + $0x8] sm:$0xff]   ;;  %v569_v9 = vld [vmem:[%s660_s1] sm:$0xff]   ;;  %s172_s13 = scalar_lea.vmem %s662_s3, %s445_s21 }
   0xe   : > { %516 = vmatprep.subr.bf16.mxu0 %v563_v1  ;;  %539 = vmatprep.subr.bf16.mxu1 %v563_v1  ;;  %v570_v4 = vld [vmem:[%s627_s24] sm:$0xff]   ;;  %v571_v5 = vld [vmem:[%s627_s24 + $0x10] sm:$0xff]   ;;  %v572_v10 = vld [vmem:[%s627_s24 + $0x8] sm:$0xff]  }
   0xf   : > { %530 = vmatprep.mubr.bf16.mxu0 %v570_v4  ;;  %534 = vmatprep.mubr.bf16.mxu1 %v571_v5  ;;  %v573_v11 = vld [vmem:[%s627_s24 + $0x18] sm:$0xff]   ;;  %v448_v14 = vld [vmem:[%s661_s2] ss:$0 sm:$0xff] }
  0x11   : > { %517 = vmatpush3.bf16.msra.mxu0 %v563_v1  ;;  %547 = vmatpush3.bf16.msra.mxu1 %v563_v1 }
  0x12   : > { %518 = vmatprep.subr.bf16.mxu0 %v564_v2  ;;  %540 = vmatprep.subr.bf16.mxu1 %v564_v2 }
  0x15   : > { %519 = vmatpush3.bf16.msra.mxu0 %v564_v2  ;;  %548 = vmatpush3.bf16.msra.mxu1 %v564_v2 }
  0x16   : > { %520 = vmatprep.subr.bf16.mxu0 %v565_v3  ;;  %541 = vmatprep.subr.bf16.mxu1 %v565_v3 }
  0x19   : > { %521 = vmatpush3.bf16.msra.mxu0 %v565_v3  ;;  %549 = vmatpush3.bf16.msra.mxu1 %v565_v3 }
  0x1a   : > { %522 = vmatprep.subr.bf16.mxu0 %v566_v6  ;;  %542 = vmatprep.subr.bf16.mxu1 %v566_v6 }
  0x1d   : > { %523 = vmatpush3.bf16.msra.mxu0 %v566_v6  ;;  %550 = vmatpush3.bf16.msra.mxu1 %v566_v6 }
  0x1e   : > { %524 = vmatprep.subr.bf16.mxu0 %v567_v7  ;;  %543 = vmatprep.subr.bf16.mxu1 %v567_v7 }
  0x21   : > { %525 = vmatpush3.bf16.msra.mxu0 %v567_v7  ;;  %551 = vmatpush3.bf16.msra.mxu1 %v567_v7 }
  0x22   : > { %526 = vmatprep.subr.bf16.mxu0 %v568_v8  ;;  %544 = vmatprep.subr.bf16.mxu1 %v568_v8 }
  0x25   : > { %527 = vmatpush3.bf16.msra.mxu0 %v568_v8  ;;  %552 = vmatpush3.bf16.msra.mxu1 %v568_v8 }
  0x26   : > { %528 = vmatprep.subr.bf16.mxu0 %v569_v9  ;;  %545 = vmatprep.subr.bf16.mxu1 %v569_v9 }
  0x29   : > { %529 = vmatpush3.bf16.msra.mxu0 %v569_v9  ;;  %553 = vmatpush3.bf16.msra.mxu1 %v569_v9 }
  0x2c   : > { %531 = vmatmul.mubr.bf16.vlgmr.msra.gmra.mxu0 %v572_v10  ;;  %535 = vmatmul.mubr.bf16.vlgmr.msra.gmra.mxu1 %v573_v11 }
  0xec   : > { %v532_v12 = vpop.f32.mrf.mxu0  ;;  %v536_v13 = vpop.f32.mrf.mxu1 }
  0xed   : > { %v321_v19 = vadd.f32 %v532_v12, %v448_v14  ;;  %v337_v20 = vadd.f32 %v536_v13, %v448_v14 }
  0xee   : > { %v312_v15 = vpop.f32.mrf.mxu0  ;;  %v328_v16 = vpop.f32.mrf.mxu1 }
  0xef   : > { %v313_v23 = vadd.f32 %v448_v14, %v312_v15  ;;  %v329_v24 = vadd.f32 %v448_v14, %v328_v16 }
  0xf0   : > { %v533_v17 = vpop.f32.mrf.mxu0  ;;  %v537_v18 = vpop.f32.mrf.mxu1 }
  0xf1   : > { %v324_v21 = vadd.f32 %v533_v17, %v448_v14  ;;  %v340_v22 = vadd.f32 %v537_v18, %v448_v14 }
  0xf2   : > { %v315_v25 = vpop.f32.mrf.mxu0  ;;  %v331_v26 = vpop.f32.mrf.mxu1 }
  0xf3   : > { %v487_v27 = vpack.c.bf16 %v324_v21, %v321_v19  ;;  %v497_v28 = vpack.c.bf16 %v340_v22, %v337_v20  ;;  %v316_v29 = vadd.f32 %v448_v14, %v315_v25  ;;  %v332_v30 = vadd.f32 %v448_v14, %v331_v26 }
  0xf5   : > { %499 = vst [vmem:[%s172_s13 + $0x8] sm:$0xff] %v487_v27   ;;  %501 = vst [vmem:[%s172_s13 + $0x18] sm:$0xff] %v497_v28   ;;  %v482_v31 = vpack.c.bf16 %v316_v29, %v313_v23  ;;  %v492_v32 = vpack.c.bf16 %v332_v30, %v329_v24 }
  0xf7   : > { %483 = vst [vmem:[%s172_s13] sm:$0xff] %v482_v31   ;;  %500 = vst [vmem:[%s172_s13 + $0x10] sm:$0xff] %v492_v32  }
  0xf8 PF: > { %s13_s12 = sadd.s32 1, %s580_s12  }
  0xf9   : > { %p10_p4 = scmp.ge.s32.totalorder %s13_s12, 4  }
  0xfb   :  { %12 = sbr.rel (!%p10_p4) target bundleno = 1 (0x1), region = 62 }

// kernel: _lambda_.19
= control target key start
LH: loop header
LB: loop body
LE: loop exit
PB: predicated region body
PF: predicated region fallthrough
CT: control target
= control target key end

     0   :  { %s472_s9 = smov 0   ;;  %s514_s0 = inlined_call_operand.vmem [shape: bf16[2,8,8,128], index: 0, kind: input, shape index: {}]   ;;  %s515_s1 = inlined_call_operand.vmem [shape: f32[4,128], index: 1, kind: input, shape index: {}]   ;;  %s516_s2 = inlined_call_operand.vmem [shape: f32[2,8,8,128], index: 2, kind: output, shape index: {}]  }
   0x1 LB: > { %s359_s10 = sadd.s32 4294967295, %s454_s9   ;;  %p363_p0 = scmp.ge.s32.totalorder %s454_s9, 1  ;;  %s454_s9 = sphi %s472_s9, %s12_s9  }
   0x2   : > { %p112_p1 = scmp.lt.s32.totalorder %s454_s9, 3 }
   0x4   : > { %p113_p2 = pnand %p363_p0, %p112_p1 }
   0x5   : > { %p134_p3 = scmp.lt.s32.totalorder (!%p113_p2), %s359_s10, 1 }
   0x6   : > { %116 = sbr.rel (%p113_p2) target bundleno = 66 (0x42), region = 28 }
   0xb   : > { %s518_s10 = smov (!%p134_p3, %s359_s10), 1  ;;  %v161_v35 = vlaneseq  ;;  %v160_v39 = vld [vmem:[%s515_s1] sm:$0xf]  ;;  %v456_v56 = vmov 0  }
   0xc   : > { %s370_s11 = sshll.u32 %s518_s10, 5  ;;  %vm236_vm0 = vcmp.gt.f32.partialorder %v160_v39, 0.5  ;;  %s371_s17 = sshll.u32 %s518_s10, 6 }
   0xd   : > { %s138_s14 = scalar_lea.vmem %s514_s0, %s370_s11  ;;  %v162_v42 = vshrl.u32 %v161_v35, 7  ;;  %v237_v57 = vsel %vm236_vm0, 1, %v456_v56  ;;  %s497_s20 = scalar_lea.vmem %s516_s2, %s371_s17 }
   0xe   : > { %v373_v0 = vld [vmem:[%s138_s14] sm:$0xff]   ;;  %v388_v1 = vld [vmem:[%s138_s14 + $0x8] sm:$0xff]   ;;  %v389_v2 = vld [vmem:[%s138_s14 + $0x10] sm:$0xff]  }
   0xf   : > { %v374_v3 = vunpack.c.l.bf16 %v373_v0  ;;  %v375_v4 = vunpack.c.h.bf16 %v373_v0  ;;  %v378_v5 = vunpack.c.l.bf16 %v388_v1  ;;  %v379_v6 = vunpack.c.h.bf16 %v388_v1  ;;  %v390_v7 = vld [vmem:[%s138_s14 + $0x18] sm:$0xff]  }
  0x10   : > { %v382_v8 = vunpack.c.l.bf16 %v389_v2  ;;  %v383_v9 = vunpack.c.h.bf16 %v389_v2  ;;  %v386_v10 = vunpack.c.l.bf16 %v390_v7  ;;  %v387_v11 = vunpack.c.h.bf16 %v390_v7 }
  0x11   : > { %v172_v12 = vsub.f32 0.0, %v374_v3  ;;  %v173_v13 = vsub.f32 0.0, %v375_v4  ;;  %v174_v14 = vsub.f32 0.0, %v378_v5  ;;  %v175_v15 = vsub.f32 0.0, %v379_v6 }
  0x12   : > { %v176_v16 = vsub.f32 0.0, %v382_v8  ;;  %v177_v17 = vsub.f32 0.0, %v383_v9  ;;  %v178_v18 = vsub.f32 0.0, %v386_v10  ;;  %v179_v22 = vsub.f32 0.0, %v387_v11 }
  0x13   : > { %v180_v19 = vmul.f32 1.442695, %v172_v12  ;;  %v182_v20 = vmul.f32 1.442695, %v173_v13  ;;  %v184_v21 = vmul.f32 1.442695, %v174_v14  ;;  %v163_v63 = vcvt.s32.f32 %v162_v42 }
  0x14   : > { %v186_v23 = vmul.f32 1.442695, %v175_v15  ;;  %v188_v24 = vmul.f32 1.442695, %v176_v16  ;;  %v190_v25 = vmul.f32 1.442695, %v177_v17 }
  0x15   : > { %400 = vpow2.f32 %v180_v19  ;;  %v192_v26 = vmul.f32 1.442695, %v178_v18  ;;  %v194_v27 = vmul.f32 1.442695, %v179_v22  ;;  %v220_v28 = vmul.f32 1.442695, %v374_v3 }
  0x16   : > { %402 = vpow2.f32 %v182_v20  ;;  %v222_v29 = vmul.f32 1.442695, %v375_v4  ;;  %v224_v30 = vmul.f32 1.442695, %v378_v5  ;;  %v226_v31 = vmul.f32 1.442695, %v379_v6 }
  0x17   : > { %404 = vpow2.f32 %v184_v21  ;;  %v228_v32 = vmul.f32 1.442695, %v382_v8  ;;  %v230_v33 = vmul.f32 1.442695, %v383_v9  ;;  %v232_v34 = vmul.f32 1.442695, %v386_v10 }
  0x18   : > { %406 = vpow2.f32 %v186_v23  ;;  %v234_v36 = vmul.f32 1.442695, %v387_v11  ;;  %v240_v52 = vsub.s32 2, %v162_v42  ;;  %v253_v53 = vsub.s32 0, %v162_v42 }
  0x19   : > { %408 = vpow2.f32 %v188_v24  ;;  %v266_v60 = vsub.s32 1, %v162_v42  ;;  %v286_v6 = vsub.s32 3, %v162_v42 }
  0x1a   : > { %410 = vpow2.f32 %v190_v25  ;;  %v241_v0 = vrot.slane %v237_v57, %v240_v52  ;;  %v254_v1 = vrot.slane %v160_v39, %v253_v53 }
  0x1b   : > { %412 = vpow2.f32 %v192_v26  ;;  %v267_v4 = vrot.slane %v160_v39, %v266_v60  ;;  %v287_v14 = vrot.slane %v160_v39, %v286_v6 }
  0x1c   : > { %414 = vpow2.f32 %v194_v27  ;;  %vm242_vm1 = vcmp.eq.s32.totalorder %v241_v0, 1  ;;  %v255_v8 = vmul.f32 %v254_v1, %v163_v63 }
  0x1d   : > { %416 = vpow2.f32 %v220_v28  ;;  %v268_v11 = vmul.f32 0.0, %v267_v4  ;;  %v270_v18 = vmul.f32 2.0, %v267_v4  ;;  %v271_v19 = vmul.f32 3.0, %v267_v4 }
  0x1e   : > { %418 = vpow2.f32 %v222_v29  ;;  %v272_v23 = vmul.f32 4.0, %v267_v4  ;;  %v273_v24 = vmul.f32 5.0, %v267_v4  ;;  %v274_v29 = vmul.f32 6.0, %v267_v4 }
  0x1f   : > { %420 = vpow2.f32 %v224_v30 }
  0x20   : > { %422 = vpow2.f32 %v226_v31 }
  0x21   : > { %424 = vpow2.f32 %v228_v32 }
  0x22   : > { %v401_v37 = vpop.eup %400  ;;  %426 = vpow2.f32 %v230_v33 }
  0x23   : > { %v403_v38 = vpop.eup %402  ;;  %v196_v40 = vadd.f32 1.0, %v401_v37  ;;  %428 = vpow2.f32 %v232_v34  ;;  %v275_v34 = vmul.f32 7.0, %v267_v4 }
  0x24   : > { %v405_v41 = vpop.eup %404  ;;  %v197_v43 = vadd.f32 1.0, %v403_v38  ;;  %430 = vpow2.f32 %v234_v36 }
  0x25   : > { %v407_v44 = vpop.eup %406  ;;  %v198_v45 = vadd.f32 1.0, %v405_v41  ;;  %432 = vrcp.f32 %v196_v40 }
  0x26   : > { %v409_v46 = vpop.eup %408  ;;  %v199_v47 = vadd.f32 1.0, %v407_v44  ;;  %434 = vrcp.f32 %v197_v43 }
  0x27   : > { %v411_v48 = vpop.eup %410  ;;  %v200_v49 = vadd.f32 1.0, %v409_v46  ;;  %436 = vrcp.f32 %v198_v45 }
  0x28   : > { %v413_v50 = vpop.eup %412  ;;  %v201_v51 = vadd.f32 1.0, %v411_v48  ;;  %438 = vrcp.f32 %v199_v47 }
  0x29   : > { %v415_v54 = vpop.eup %414  ;;  %v202_v55 = vadd.f32 1.0, %v413_v50  ;;  %440 = vrcp.f32 %v200_v49 }
  0x2a   : > { %v417_v58 = vpop.eup %416  ;;  %v203_v59 = vadd.f32 1.0, %v415_v54  ;;  %442 = vrcp.f32 %v201_v51 }
  0x2b   : > { %v419_v61 = vpop.eup %418  ;;  %444 = vrcp.f32 %v202_v55 }
  0x2c   : > { %v421_v62 = vpop.eup %420  ;;  %446 = vrcp.f32 %v203_v59 }
  0x2d   : > { %v423_v2 = vpop.eup %422 }
  0x2e   : > { %v425_v3 = vpop.eup %424 }
  0x2f   : > { %v427_v5 = vpop.eup %426 }
  0x30   : > { %v429_v7 = vpop.eup %428 }
  0x31   : > { %v431_v9 = vpop.eup %430 }
  0x32   : > { %v433_v10 = vpop.eup %432 }
  0x33   : > { %v435_v12 = vpop.eup %434  ;;  %v243_v13 = vsel %vm242_vm1, %v417_v58, %v433_v10 }
  0x34   : > { %v437_v15 = vpop.eup %436  ;;  %v256_v16 = vadd.f32 %v255_v8, %v243_v13  ;;  %v244_v17 = vsel %vm242_vm1, %v419_v61, %v435_v12 }
  0x35   : > { %v439_v20 = vpop.eup %438  ;;  %v257_v21 = vadd.f32 %v255_v8, %v244_v17  ;;  %v245_v22 = vsel %vm242_vm1, %v421_v62, %v437_v15 }
  0x36   : > { %v441_v25 = vpop.eup %440  ;;  %v276_v26 = vadd.f32 %v268_v11, %v256_v16  ;;  %v258_v27 = vadd.f32 %v255_v8, %v245_v22  ;;  %v246_v28 = vsel %vm242_vm1, %v423_v2, %v439_v20 }
  0x37   : > { %v443_v30 = vpop.eup %442  ;;  %v277_v31 = vadd.f32 %v267_v4, %v257_v21  ;;  %v259_v32 = vadd.f32 %v255_v8, %v246_v28  ;;  %v247_v33 = vsel %vm242_vm1, %v425_v3, %v441_v25 }
  0x38   : > { %v445_v35 = vpop.eup %444  ;;  %v288_v36 = vmul.f32 %v287_v14, %v276_v26  ;;  %v278_v37 = vadd.f32 %v270_v18, %v258_v27  ;;  %v260_v38 = vadd.f32 %v255_v8, %v247_v33  ;;  %v248_v39 = vsel %vm242_vm1, %v427_v5, %v443_v30 }
  0x39   : > { %v447_v40 = vpop.eup %446  ;;  %v289_v41 = vmul.f32 %v287_v14, %v277_v31  ;;  %v279_v42 = vadd.f32 %v271_v19, %v259_v32  ;;  %v261_v43 = vadd.f32 %v255_v8, %v248_v39  ;;  %v249_v44 = vsel %vm242_vm1, %v429_v7, %v445_v35 }
  0x3a   : > { %296 = vst [vmem:[%s497_s20] sm:$0xff] %v288_v36  ;;  %v290_v45 = vmul.f32 %v287_v14, %v278_v37  ;;  %v280_v46 = vadd.f32 %v272_v23, %v260_v38  ;;  %v262_v47 = vadd.f32 %v255_v8, %v249_v44  ;;  %v250_v48 = vsel %vm242_vm1, %v431_v9, %v447_v40 }
  0x3b   : > { %297 = vst [vmem:[%s497_s20 + $0x8] sm:$0xff] %v289_v41  ;;  %v291_v49 = vmul.f32 %v287_v14, %v279_v42  ;;  %v281_v50 = vadd.f32 %v273_v24, %v261_v43  ;;  %v263_v51 = vadd.f32 %v255_v8, %v250_v48 }
  0x3c   : > { %298 = vst [vmem:[%s497_s20 + $0x10] sm:$0xff] %v290_v45  ;;  %v292_v52 = vmul.f32 %v287_v14, %v280_v46  ;;  %v282_v53 = vadd.f32 %v274_v29, %v262_v47 }
  0x3d   : > { %299 = vst [vmem:[%s497_s20 + $0x18] sm:$0xff] %v291_v49  ;;  %v293_v54 = vmul.f32 %v287_v14, %v281_v50  ;;  %v283_v55 = vadd.f32 %v275_v34, %v263_v51 }
  0x3e   : > { %300 = vst [vmem:[%s497_s20 + $0x20] sm:$0xff] %v292_v52  ;;  %v294_v56 = vmul.f32 %v287_v14, %v282_v53 }
  0x3f   : > { %301 = vst [vmem:[%s497_s20 + $0x28] sm:$0xff] %v293_v54  ;;  %v295_v57 = vmul.f32 %v287_v14, %v283_v55 }
  0x40   : > { %302 = vst [vmem:[%s497_s20 + $0x30] sm:$0xff] %v294_v56 }
  0x41   : > { %303 = vst [vmem:[%s497_s20 + $0x38] sm:$0xff] %v295_v57 }
  0x42 PF: > { %s12_s9 = sadd.s32 1, %s454_s9  }
  0x43   : > { %p9_p4 = scmp.ge.s32.totalorder %s12_s9, 4  }
  0x45   :  { %11 = sbr.rel (!%p9_p4) target bundleno = 1 (0x1), region = 58 }

</bundles_post_ra>
